<compile_context>
chip_gen: v7x
topology: tpu7x:2x2x1
jax: 0.10.0
libtpu: 0.0.40
codegen_flags: <defaults>
</compile_context>

<pallas_src>
import functools

import jax
import jax.numpy as jnp
from jax.experimental import pallas as pl
from jax.experimental.pallas import tpu as pltpu


# ---------------------------------------------------------------------------
# Kernel A: fused pooling pass over the channel (reduction) axis.
#   corr_ref : (1, TC, P) tile of corr
#   max_ref  : (1, 1, P)  running max over channels      (resident across c)
#   avg_ref  : (1, 1, P)  mean, written only at finalize (resident across c)
#   csum_ref : (1, 1, TC) per-channel spatial sums, lane-dense
#   sum_sc   : (1, 1, P)  f32 running-sum scratch (VMEM)
# ---------------------------------------------------------------------------
def _pool_kernel(corr_ref, max_ref, avg_ref, csum_ref, sum_sc, *,
                 n_chan, lane_chunk):
    c_blk = pl.program_id(1)
    n_cblk = pl.num_programs(1)
    tc = corr_ref.shape[1]
    p = corr_ref.shape[2]

    @pl.when(c_blk == 0)
    def _init():
        max_ref[...] = jnp.full(max_ref.shape, -jnp.inf, max_ref.dtype)
        sum_sc[...] = jnp.zeros(sum_sc.shape, jnp.float32)

    # Process the (TC, P) tile in static lane chunks to bound vreg pressure
    # when P is large (for the small test case this is a single chunk).
    csum_acc = None
    for j in range(0, p, lane_chunk):
        e = min(j + lane_chunk, p)
        xj = corr_ref[0, :, j:e].astype(jnp.float32)            # (TC, chunk)

        blk_max = jnp.max(xj, axis=0, keepdims=True)            # (1, chunk)
        blk_sum = jnp.sum(xj, axis=0, keepdims=True)            # (1, chunk)
        max_ref[0, :, j:e] = jnp.maximum(max_ref[0, :, j:e],
                                         blk_max.astype(max_ref.dtype))
        sum_sc[0, :, j:e] = sum_sc[0, :, j:e] + blk_sum

        part = jnp.sum(xj, axis=1, keepdims=True)               # (TC, 1)
        csum_acc = part if csum_acc is None else csum_acc + part

    # Lane-dense per-channel sums: channels on lanes.
    csum_ref[...] = csum_acc.reshape(1, 1, tc)

    @pl.when(c_blk == n_cblk - 1)
    def _finalize():
        # mean epilogue: one cheap VPU multiply at the end, not per block.
        avg_ref[...] = (sum_sc[...] * jnp.float32(1.0 / n_chan)
                        ).astype(avg_ref.dtype)


# ---------------------------------------------------------------------------
# Kernel B: batched channel gather. grid=(bs,); all k selected channels of a
# batch are fetched with overlapped manual DMAs (HBM -> lane-dense VMEM out
# block). Indices arrive via scalar prefetch (SMEM).
# ---------------------------------------------------------------------------
def _gather_kernel(sel_ref, corr_hbm, out_ref, sem, *, idx_num, n_chan):
    b = pl.program_id(0)
    copies = []
    for i in range(idx_num):
        ch = sel_ref[b * idx_num + i]
        cp = pltpu.make_async_copy(corr_hbm.at[b * n_chan + ch],
                                   out_ref.at[0, i],
                                   sem.at[i])
        cp.start()
        copies.append(cp)
    for cp in copies:
        cp.wait()


def _vmem_budget_bytes():
    """Per-generation input-block budget + scoped VMEM limit."""
    cap = None
    try:
        info = pltpu.get_tpu_info()
        cap = getattr(info, "vmem_capacity_bytes", None)
    except Exception:
        cap = None
    if not cap:
        cap = 64 << 20                       # conservative (v7x physical VMEM)
    vmem_limit = int(min(cap // 2, 64 << 20))
    # double-buffered input + resident (1,1,p) outputs + scratch must fit.
    block_budget = int(max(1 << 20, min(vmem_limit // 4, 16 << 20)))
    return block_budget, vmem_limit


def _pick_channel_tile(n_chan, p, itemsize, budget):
    """Channel tile: multiple of 128 dividing n_chan (lane-dense csum block),
    or the full channel dim; as large as fits the VMEM block budget."""
    if n_chan * p * itemsize <= budget:
        return n_chan
    divisors = [t for t in range(128, n_chan, 128) if n_chan % t == 0]
    if not divisors:
        return n_chan
    fitting = [t for t in divisors if t * p * itemsize <= budget]
    return max(fitting) if fitting else min(divisors)


def poolopt_on_corrmat(corr, select_indices):
    bs, n_chan, h, w = corr.shape
    p = h * w
    corr_r = corr.reshape(bs, n_chan, p)     # lane-dense layout, P on lanes

    block_budget, vmem_limit = _vmem_budget_bytes()
    tc = _pick_channel_tile(n_chan, p, jnp.dtype(corr.dtype).itemsize,
                            block_budget)
    lane_chunk = min(p, 1024)

    pool = functools.partial(_pool_kernel, n_chan=n_chan, lane_chunk=lane_chunk)
    max_out, avg_out, csum = pl.pallas_call(
        pool,
        out_shape=(
            jax.ShapeDtypeStruct((bs, 1, p), corr.dtype),       # max
            jax.ShapeDtypeStruct((bs, 1, p), corr.dtype),       # avg
            jax.ShapeDtypeStruct((bs, 1, n_chan), jnp.float32),  # channel sums
        ),
        grid_spec=pltpu.PrefetchScalarGridSpec(
            num_scalar_prefetch=0,
            grid=(bs, n_chan // tc),           # channel (reduction) axis innermost
            in_specs=[pl.BlockSpec((1, tc, p), lambda b, c: (b, c, 0))],
            out_specs=(
                pl.BlockSpec((1, 1, p), lambda b, c: (b, 0, 0)),    # max (resident)
                pl.BlockSpec((1, 1, p), lambda b, c: (b, 0, 0)),    # avg (resident)
                pl.BlockSpec((1, 1, tc), lambda b, c: (b, 0, c)),   # lane-dense csum
            ),
            scratch_shapes=[pltpu.VMEM((1, 1, p), jnp.float32)],
        ),
        compiler_params=pltpu.CompilerParams(
            dimension_semantics=("parallel", "arbitrary"),
            vmem_limit_bytes=vmem_limit),
    )(corr_r)

    # ---- sort channels by spatial sum (descending), select positions ----
    # TODO(synk): torch.sort has no Pallas TPU equivalent; argsort stays in JAX glue.
    value = csum[:, 0, :]                                    # (bs, C)
    sort_idx = jnp.argsort(-value, axis=1)                   # descending
    sel = jnp.take(sort_idx, select_indices, axis=1).astype(jnp.int32)  # (bs, k)
    idx_num = int(sel.shape[1])
    sel_flat = sel.reshape(-1)

    # ---- batched in-kernel gather of the selected channels ----
    corr_flat = corr_r.reshape(bs * n_chan, p)
    gather = functools.partial(_gather_kernel, idx_num=idx_num, n_chan=n_chan)
    gathered = pl.pallas_call(
        gather,
        out_shape=jax.ShapeDtypeStruct((bs, idx_num, p), corr.dtype),
        grid_spec=pltpu.PrefetchScalarGridSpec(
            num_scalar_prefetch=1,
            grid=(bs,),
            in_specs=[pl.BlockSpec(memory_space=pl.ANY)],
            out_specs=pl.BlockSpec((1, idx_num, p), lambda b, sel: (b, 0, 0)),
            scratch_shapes=[pltpu.SemaphoreType.DMA((idx_num,))],
        ),
        compiler_params=pltpu.CompilerParams(
            dimension_semantics=("parallel",)),
    )(sel_flat, corr_flat)

    sort_corr = gathered.reshape(bs, idx_num, h, w)
    return jnp.concatenate(
        [max_out.reshape(bs, 1, h, w),
         avg_out.reshape(bs, 1, h, w),
         sort_corr],
        axis=1)


# ---------------------------------------------------------------------------
# Pure-JAX reference mirroring the PyTorch forward.
# ---------------------------------------------------------------------------
def _reference(corr, select_indices):
    max_corr = jnp.max(corr, axis=1, keepdims=True)
    avg_corr = jnp.mean(corr, axis=1, keepdims=True)
    value = jnp.sum(corr, axis=(2, 3))
    sort_idx = jnp.argsort(-value, axis=1)
    sel = jnp.take(sort_idx, select_indices, axis=1)
    sort_corr = jnp.take_along_axis(corr, sel[:, :, None, None], axis=1)
    return jnp.concatenate([max_corr, avg_corr, sort_corr], axis=1)


if __name__ == "__main__":
    key = jax.random.PRNGKey(0)
    bs, h, w = 2, 16, 16
    n_chan = h * w                               # DMAC: corr has h*w channels
    corr = jax.random.normal(key, (bs, n_chan, h, w), dtype=jnp.float32)
    select_indices = jnp.arange(8, dtype=jnp.int32)   # keep top-8 sorted channels

    out = poolopt_on_corrmat(corr, select_indices)
    out = jax.block_until_ready(out)

    ref = _reference(corr, select_indices)
    assert out.shape == (bs, 2 + int(select_indices.shape[0]), h, w), out.shape
    assert jnp.allclose(out, ref, atol=1e-5, rtol=1e-5), "mismatch vs reference"

    print("KERNEL_OK")
</pallas_src>

<mosaic_0001>
module attributes {stable_mosaic.version = 11 : i64} {
  func.func @_pool_kernel(%arg0: i32, %arg1: i32, %arg2: memref<1x256x256xf32, #tpu.memory_space<vmem>>, %arg3: memref<1x1x256xf32, #tpu.memory_space<vmem>>, %arg4: memref<1x1x256xf32, #tpu.memory_space<vmem>>, %arg5: memref<1x1x256xf32, #tpu.memory_space<vmem>>, %arg6: memref<1x1x256xf32, #tpu.memory_space<vmem>>) attributes {dimension_semantics = [#tpu.dimension_semantics<parallel>, #tpu.dimension_semantics<arbitrary>], iteration_bounds = array<i64: 2, 1>, scalar_prefetch = 0 : i64, scratch_operands = 1 : i64, tpu.core_type = #tpu.core_type<tc>, window_params = [{transform_indices = @transform_0, window_bounds = array<i64: 1, 256, 256>}, {transform_indices = @transform_1, window_bounds = array<i64: 1, 1, 256>}, {transform_indices = @transform_2, window_bounds = array<i64: 1, 1, 256>}, {transform_indices = @transform_3, window_bounds = array<i64: 1, 1, 256>}]} {
    %c0_i32 = arith.constant 0 : i32
    %0 = arith.cmpi eq, %arg1, %c0_i32 : i32
    %1 = arith.extui %0 : i1 to i32
    %c0_i32_0 = arith.constant 0 : i32
    %2 = arith.cmpi ne, %1, %c0_i32_0 : i32
    scf.if %2 {
      %cst_22 = arith.constant 0xFF800000 : f32
      %28 = vector.broadcast %cst_22 : f32 to vector<1x1x256xf32>
      %c0_23 = arith.constant 0 : index
      %c0_24 = arith.constant 0 : index
      %c0_25 = arith.constant 0 : index
      %29 = vector.load %arg3[%c0_23, %c0_24, %c0_25] : memref<1x1x256xf32, #tpu.memory_space<vmem>>, vector<1x1x256xf32>
      tpu.vector_store %arg3[%c0_23, %c0_24, %c0_25], %28 {strides = array<i32>} : memref<1x1x256xf32, #tpu.memory_space<vmem>>, vector<1x1x256xf32>,
      %cst_26 = arith.constant 0.000000e+00 : f32
      %30 = vector.broadcast %cst_26 : f32 to vector<1x1x256xf32>
      %c0_27 = arith.constant 0 : index
      %c0_28 = arith.constant 0 : index
      %c0_29 = arith.constant 0 : index
      %31 = vector.load %arg6[%c0_27, %c0_28, %c0_29] : memref<1x1x256xf32, #tpu.memory_space<vmem>>, vector<1x1x256xf32>
      tpu.vector_store %arg6[%c0_27, %c0_28, %c0_29], %30 {strides = array<i32>} : memref<1x1x256xf32, #tpu.memory_space<vmem>>, vector<1x1x256xf32>,
    } else {
    }
    %c0 = arith.constant 0 : index
    %c0_1 = arith.constant 0 : index
    %c0_2 = arith.constant 0 : index
    %3 = vector.load %arg2[%c0, %c0_1, %c0_2] : memref<1x256x256xf32, #tpu.memory_space<vmem>>, vector<1x256x256xf32>
    %4 = vector.shape_cast %3 : vector<1x256x256xf32> to vector<256x256xf32>
    %cst = arith.constant dense<0xFF800000> : vector<256xf32>
    %5 = vector.multi_reduction <maximumf>, %4, %cst [0] : vector<256x256xf32> to vector<256xf32>
    %6 = vector.shape_cast %5 : vector<256xf32> to vector<1x256xf32>
    %cst_3 = arith.constant dense<0.000000e+00> : vector<256xf32>
    %7 = vector.multi_reduction <add>, %4, %cst_3 [0] : vector<256x256xf32> to vector<256xf32>
    %8 = vector.shape_cast %7 : vector<256xf32> to vector<1x256xf32>
    %c0_4 = arith.constant 0 : index
    %c0_5 = arith.constant 0 : index
    %c0_6 = arith.constant 0 : index
    %9 = vector.load %arg3[%c0_4, %c0_5, %c0_6] : memref<1x1x256xf32, #tpu.memory_space<vmem>>, vector<1x1x256xf32>
    %10 = vector.shape_cast %9 : vector<1x1x256xf32> to vector<1x256xf32>
    %11 = arith.maximumf %10, %6 : vector<1x256xf32>
    %c0_7 = arith.constant 0 : index
    %c0_8 = arith.constant 0 : index
    %c0_9 = arith.constant 0 : index
    %12 = vector.load %arg3[%c0_7, %c0_8, %c0_9] : memref<1x1x256xf32, #tpu.memory_space<vmem>>, vector<1x1x256xf32>
    %13 = vector.shape_cast %12 : vector<1x1x256xf32> to vector<1x256xf32>
    %14 = vector.shape_cast %11 : vector<1x256xf32> to vector<1x1x256xf32>
    tpu.vector_store %arg3[%c0_7, %c0_8, %c0_9], %14 {strides = array<i32>} : memref<1x1x256xf32, #tpu.memory_space<vmem>>, vector<1x1x256xf32>,
    %c0_10 = arith.constant 0 : index
    %c0_11 = arith.constant 0 : index
    %c0_12 = arith.constant 0 : index
    %15 = vector.load %arg6[%c0_10, %c0_11, %c0_12] : memref<1x1x256xf32, #tpu.memory_space<vmem>>, vector<1x1x256xf32>
    %16 = vector.shape_cast %15 : vector<1x1x256xf32> to vector<1x256xf32>
    %17 = arith.addf %16, %8 : vector<1x256xf32>
    %c0_13 = arith.constant 0 : index
    %c0_14 = arith.constant 0 : index
    %c0_15 = arith.constant 0 : index
    %18 = vector.load %arg6[%c0_13, %c0_14, %c0_15] : memref<1x1x256xf32, #tpu.memory_space<vmem>>, vector<1x1x256xf32>
    %19 = vector.shape_cast %18 : vector<1x1x256xf32> to vector<1x256xf32>
    %20 = vector.shape_cast %17 : vector<1x256xf32> to vector<1x1x256xf32>
    tpu.vector_store %arg6[%c0_13, %c0_14, %c0_15], %20 {strides = array<i32>} : memref<1x1x256xf32, #tpu.memory_space<vmem>>, vector<1x1x256xf32>,
    %cst_16 = arith.constant dense<0.000000e+00> : vector<256xf32>
    %21 = vector.multi_reduction <add>, %4, %cst_16 [1] : vector<256x256xf32> to vector<256xf32>
    %22 = vector.shape_cast %21 : vector<256xf32> to vector<256x1xf32>
    %23 = vector.shape_cast %22 : vector<256x1xf32> to vector<1x1x256xf32>
    %c0_17 = arith.constant 0 : index
    %c0_18 = arith.constant 0 : index
    %c0_19 = arith.constant 0 : index
    %24 = vector.load %arg5[%c0_17, %c0_18, %c0_19] : memref<1x1x256xf32, #tpu.memory_space<vmem>>, vector<1x1x256xf32>
    tpu.vector_store %arg5[%c0_17, %c0_18, %c0_19], %23 {strides = array<i32>} : memref<1x1x256xf32, #tpu.memory_space<vmem>>, vector<1x1x256xf32>,
    %c0_i32_20 = arith.constant 0 : i32
    %25 = arith.cmpi eq, %arg1, %c0_i32_20 : i32
    %26 = arith.extui %25 : i1 to i32
    %c0_i32_21 = arith.constant 0 : i32
    %27 = arith.cmpi ne, %26, %c0_i32_21 : i32
    scf.if %27 {
      %c0_22 = arith.constant 0 : index
      %c0_23 = arith.constant 0 : index
      %c0_24 = arith.constant 0 : index
      %28 = vector.load %arg6[%c0_22, %c0_23, %c0_24] : memref<1x1x256xf32, #tpu.memory_space<vmem>>, vector<1x1x256xf32>
      %cst_25 = arith.constant 3.906250e-03 : f32
      %29 = vector.broadcast %cst_25 : f32 to vector<1x1x256xf32>
      %30 = arith.mulf %28, %29 : vector<1x1x256xf32>
      %c0_26 = arith.constant 0 : index
      %c0_27 = arith.constant 0 : index
      %c0_28 = arith.constant 0 : index
      %31 = vector.load %arg4[%c0_26, %c0_27, %c0_28] : memref<1x1x256xf32, #tpu.memory_space<vmem>>, vector<1x1x256xf32>
      tpu.vector_store %arg4[%c0_26, %c0_27, %c0_28], %30 {strides = array<i32>} : memref<1x1x256xf32, #tpu.memory_space<vmem>>, vector<1x1x256xf32>,
    } else {
    }
    return
  }
  func.func @transform_0(%arg0: i32, %arg1: i32) -> (i32, i32, i32) {
    %c0_i32 = arith.constant 0 : i32
    %c0_i32_0 = arith.constant 0 : i32
    return %arg0, %arg1, %c0_i32 : i32, i32, i32
  }
  func.func @transform_1(%arg0: i32, %arg1: i32) -> (i32, i32, i32) {
    %c0_i32 = arith.constant 0 : i32
    %c0_i32_0 = arith.constant 0 : i32
    %c0_i32_1 = arith.constant 0 : i32
    return %arg0, %c0_i32, %c0_i32_0 : i32, i32, i32
  }
  func.func @transform_2(%arg0: i32, %arg1: i32) -> (i32, i32, i32) {
    %c0_i32 = arith.constant 0 : i32
    %c0_i32_0 = arith.constant 0 : i32
    %c0_i32_1 = arith.constant 0 : i32
    return %arg0, %c0_i32, %c0_i32_0 : i32, i32, i32
  }
  func.func @transform_3(%arg0: i32, %arg1: i32) -> (i32, i32, i32) {
    %c0_i32 = arith.constant 0 : i32
    %c0_i32_0 = arith.constant 0 : i32
    return %arg0, %c0_i32, %arg1 : i32, i32, i32
  }
}

</mosaic_0001>

<bundles_post_ra>
// kernel: tpu_custom_call.1
= control target key start
LH: loop header
LB: loop body
LE: loop exit
PB: predicated region body
PF: predicated region fallthrough
CT: control target
= control target key end

     0   :  { %9 = vsyncpa [#allocation4], 0  ;;  %s5312_s0 = inlined_call_operand.hbm [shape: f32[2,256,256], index: 0, kind: input, shape index: {}]   ;;  %s5313_s1 = inlined_call_operand.hbm [shape: f32[2,1,256], index: 1, kind: output, shape index: {0}]   ;;  %s5314_s2 = inlined_call_operand.hbm [shape: f32[2,1,256], index: 2, kind: output, shape index: {1}]   ;;  %s5315_s3 = inlined_call_operand.hbm [shape: f32[2,1,256], index: 3, kind: output, shape index: {2}]  }
   0x1   :  { %11 = vsyncpa [#allocation4 + $0x1], 0 }
   0x2   :  { %12 = vsyncpa [#allocation5], 0 }
   0x3   :  { %14 = vsyncpa [#allocation5 + $0x1], 0 }
   0x4   :  { %15 = vsyncpa [#allocation8], 0 }
   0x5   :  { %17 = vsyncpa [#allocation8 + $0x1], 0  ;;  %s4036_s12 = smov 0   ;;  %s4038_s13 = smov 0  }
   0x6   :  { %s4040_s14 = smov 0   ;;  %s4042_s15 = smov 0  }
   0x7   :  { %s4044_s16 = smov 0   ;;  %s4046_s17 = smov 0  }
   0x8 LB: > { %s4067_s18 = sadd.s32 4294967295, %s4004_s17   ;;  %s3726_s19 = sadd.s32 4294967294, %s4004_s17   ;;  %s4004_s17 = sphi %s4046_s17, %s23_s17   ;;  %s4000_s16 = sphi %s4044_s16, %s5332_s16   ;;  %s3996_s15 = sphi %s4042_s15, %s5331_s15   ;;  %s3992_s14 = sphi %s4040_s14, %s5330_s14   ;;  %s3988_s13 = sphi %s4038_s13, %s5329_s13   ;;  %s3984_s12 = sphi %s4036_s12, %s5328_s12  }
   0x9   : > { %s35_s20 = sadd.s32 1, %s4000_s16  ;;  %s44_s21 = sadd.s32 1, %s3992_s14 }
   0xa   : > { %p37_p0 = scmp.ge.s32.totalorder %s35_s20, 2  ;;  %p51_p1 = scmp.ne.s32.totalorder %s3992_s14, %s3988_s13 }
   0xb   : > { %p52_p2 = scmp.eq.s32.totalorder %s4004_s17, 0  ;;  %p57_p3 = scmp.ne.s32.totalorder %s3988_s13, %s3984_s12 }
   0xc   : > { %s5334_s20 = smov (%p37_p0, %s35_s20), 0  ;;  %p58_p5 = scmp.eq.s32.totalorder %s4067_s18, 0 }
   0xd   : > { %p4079_p4 = por %p52_p2, %p51_p1  ;;  %s39_s23 = ssub.s32 %s4000_s16, %s5334_s20 }
   0xe   : > { %p81_p6 = scmp.eq.s32.totalorder %s4067_s18, 1  ;;  %p42_p7 = scmp.eq.s32.totalorder %s39_s23, 0 }
   0xf   : > { %p4087_p8 = por %p58_p5, %p57_p3  ;;  %p87_p10 = scmp.eq.s32.totalorder %s3726_s19, 1 }
  0x10   : > { %p4091_p9 = por %p81_p6, %p51_p1  ;;  %p3774_p13 = scmp.lt.s32.totalorder %s4004_s17, 2 }
  0x11   : > { %s4098_s26 = scalar_select %p42_p7, %s3992_s14, %s44_s21  }
  0x12   : > { %s5319_s25 = scalar_select %p4091_p9, 1, 0 }
  0x13   : > { %p4100_p11 = por %p87_p10, %p57_p3  ;;  %s161_s28 = sand.u32 1, %s3992_s14  }
  0x14   : > { %s3729_s29 = sshll.u32 %s161_s28, 9  ;;  %s3748_s30 = sshll.u32 %s4000_s16, 13 }
  0x15   : > { %s5320_s27 = scalar_select %p4100_p11, 1, 0 }
  0x16   : > { %s4111_s6 = scalar_lea.hbm %s5312_s0, %s3748_s30  ;;  %s165_s7 = scalar_lea.vmem [#allocation3], %s3729_s29 }
  0x17   : > { %s175_s8 = sshll.u32 %s165_s7, 4  ;;  %p4117_p0 = pnand %p3774_p13, %p4079_p4  ;;  %s4113_s8 = int_to_ptr.vmem [resolvable:$true] %s175_s8 }
  0x18   : > { %s4122_s10 = scalar_lea.sflag [#allocation4], %s161_s28  ;;  %s3832_s11 = scalar_lea.hbm %s4111_s6, 8192 }
  0x19   : > { %p3833_p2 = scmp.ne.s32.totalorder %s4111_s6, %s3832_s11  ;;  %p3834_p3 = pneg %p4117_p0 }
  0x1a   : > { %s3837_s22 = scalar_lea.hbm %s5312_s0, 16384  ;;  %p3838_p4 = scmp.lt.u32.totalorder %s4111_s6, %s5312_s0 }
  0x1b   : > { %p3835_p5 = pnand %p3834_p3, %p3833_p2  ;;  %p3839_p7 = scmp.lt.u32.totalorder %s3837_s22, %s3832_s11 }
  0x1c   : > { %p3841_p13 = scmp.lt.u32.totalorder %s3832_s11, %s4111_s6 }
  0x1d   : > { %p3836_p6 = pneg %p3835_p5  ;;  %p3840_p10 = por %p3839_p7, %p3838_p4 }
  0x1f   : > { %p3842_p12 = por %p3841_p13, %p3840_p10 }
  0x21   : > { %p3843_p1 = pnand %p3842_p12, %p3836_p6 }
  0x23   : > { %3846 = shalt.err (!%p3843_p1)
}
  0x24   : > { %s3847_s28 = scalar_lea.vmem %s4113_s8, 8192  ;;  %s4006_s4 = smov [#allocation3]  }
  0x25   : > { %p3848_p2 = scmp.ne.s32.totalorder %s4113_s8, %s3847_s28  ;;  %s3852_s5 = sshll.u32 %s4006_s4, 4  ;;  %s3853_s5 = int_to_ptr.vmem [resolvable:$false] %s3852_s5 }
  0x26   : > { %s3854_s7 = scalar_lea.vmem %s3853_s5, 16384  ;;  %p3855_p9 = scmp.lt.s32.totalorder %s4113_s8, %s3853_s5 }
  0x27   : > { %p3850_p5 = pnand %p3848_p2, %p3834_p3  ;;  %p3856_p4 = scmp.lt.s32.totalorder %s3854_s7, %s3847_s28 }
  0x29   : > { %p3851_p11 = pneg %p3850_p5  ;;  %p3857_p7 = por %p3856_p4, %p3855_p9 }
  0x2b   : > { %p3858_p10 = pnand %p3857_p7, %p3851_p11 }
  0x2d   : > { %3861 = shalt.err (!%p3858_p10)
}
  0x2e   : > { %s4007_s11 = smov 256   ;;  %s4008_s21 = smov 16  }
  0x2f   : > { %3763 = dma.hbm_to_vmem [thread:$0]  (!%p4117_p0), %s4111_s6, 8192, %s4113_s8, %s4122_s10, %s4007_s11, %s4007_s11, %s4008_s21  }
  0x30   : > { %p183_p12 = scmp.lt.s32.totalorder %s4004_s17, 3  ;;  %p5322_p1 = scmp.ge.s32.totalorder %s4004_s17, 1 }
  0x32   : > { %p184_p3 = pnand %p5322_p1, %p183_p12 }
  0x33   : > { %s4154_s23 = sand.u32 (!%p184_p3), 1, %s3988_s13  }
  0x34   : > { %187 = sbr.rel (%p184_p3) target bundleno = 531 (0x213), region = 24  ;;  %s3733_s22 = sshll.u32 (!%p184_p3), %s4154_s23, 9 }
  0x35   : > { %s190_s29 = scalar_lea.sflag (!%p184_p3), [#allocation4], %s4154_s23  ;;  %s4158_s30 = scalar_lea.vmem (!%p184_p3), [#allocation3], %s3733_s22 }
  0x3b   : > { %3971 = dma.done.wait (%p4087_p8), %s190_s29, 8192  }
  0x3c   : > { %3973 = vsyncadd (%p4087_p8), %s190_s29, 4294959104  ;;  %v242_v0 = vld [vmem:[%s4158_s30 + $0x20] sm:$0xff]  ;;  %v243_v1 = vld [vmem:[%s4158_s30 + $0x28] sm:$0xff]  ;;  %s5049_s24 = sshll.u32 %s4154_s23, 1  ;;  %s5072_s8 = sshll.u32 %s3996_s15, 5 }
  0x3d   : > { %v238_v2 = vld [vmem:[%s4158_s30] sm:$0xff]  ;;  %v502_v3 = vadd.f32 %v243_v1, %v242_v0  ;;  %v239_v4 = vld [vmem:[%s4158_s30 + $0x8] sm:$0xff]  ;;  %v244_v6 = vld [vmem:[%s4158_s30 + $0x30] sm:$0xff]  ;;  %s211_s6 = scalar_lea.vmem [#allocation6], %s5049_s24  ;;  %s5082_s4 = scalar_lea.hbm %s5313_s1, %s5072_s8 }
  0x3e   : > { %v302_v5 = vmax.f32 %v238_v2, %v242_v0  ;;  %v245_v7 = vld [vmem:[%s4158_s30 + $0x38] sm:$0xff]  ;;  %v339_v8 = vmax.f32 %v239_v4, %v243_v1  ;;  %v496_v9 = vadd.f32 %v239_v4, %v238_v2  ;;  %v240_v10 = vld [vmem:[%s4158_s30 + $0x10] sm:$0xff]  ;;  %v247_v18 = vld [vmem:[%s4158_s30 + $0x48] sm:$0xff]  ;;  %s3550_s9 = sshll.u32 %s211_s6, 4  ;;  %s3530_s15 = sand.u32 1, %s4067_s18   ;;  %s5084_s9 = int_to_ptr.vmem [resolvable:$true] %s3550_s9 }
  0x3f   : > { %v241_v11 = vld [vmem:[%s4158_s30 + $0x18] sm:$0xff]  ;;  %503 = vadd.xlane.f32.xlu1 %v502_v3  ;;  %v505_v12 = vadd.f32 %v245_v7, %v244_v6  ;;  %v303_v13 = vmax.f32 %v240_v10, %v244_v6  ;;  %v248_v16 = vld [vmem:[%s4158_s30 + $0x50] sm:$0xff]  ;;  %v376_v20 = vadd.f32 %v240_v10, %v238_v2  ;;  %v246_v21 = vld [vmem:[%s4158_s30 + $0x40] sm:$0xff]  ;;  %s3526_s5 = scalar_lea.sflag [#allocation5], %s4154_s23  ;;  %s3862_s7 = scalar_lea.vmem %s5084_s9, 32 }
  0x40   : > { %v340_v14 = vmax.f32 %v241_v11, %v245_v7  ;;  %v413_v15 = vadd.f32 %v241_v11, %v239_v4  ;;  %v249_v17 = vld [vmem:[%s4158_s30 + $0x58] sm:$0xff]  ;;  %497 = vadd.xlane.f32.xlu0 %v496_v9  ;;  %v499_v19 = vadd.f32 %v241_v11, %v240_v10  ;;  %v341_v22 = vmax.f32 %v339_v8, %v247_v18  ;;  %v251_v27 = vld [vmem:[%s4158_s30 + $0x68] sm:$0xff]  ;;  %v252_v30 = vld [vmem:[%s4158_s30 + $0x70] sm:$0xff]  ;;  %p3863_p8 = scmp.ne.s32.totalorder %s5084_s9, %s3862_s7  ;;  %p5325_p9 = scmp.ne.s32.totalorder %s5319_s25, 0 }
  0x41   : > { %v305_v24 = vmax.f32 %v303_v13, %v248_v16  ;;  %v304_v26 = vmax.f32 %v302_v5, %v246_v21  ;;  %v377_v28 = vadd.f32 %v376_v20, %v242_v0  ;;  %v511_v29 = vadd.f32 %v249_v17, %v248_v16  ;;  %v253_v31 = vld [vmem:[%s4158_s30 + $0x78] sm:$0xff]  ;;  %v250_v32 = vld [vmem:[%s4158_s30 + $0x60] sm:$0xff]  ;;  %v255_v38 = vld [vmem:[%s4158_s30 + $0x88] sm:$0xff]  ;;  %s4013_s11 = smov [#allocation6]  }
  0x42   : > { %v414_v23 = vadd.f32 %v413_v15, %v243_v1  ;;  %v342_v25 = vmax.f32 %v340_v14, %v249_v17  ;;  %v343_v33 = vmax.f32 %v341_v22, %v251_v27  ;;  %v508_v39 = vadd.f32 %v247_v18, %v246_v21  ;;  %v4182_v41 = vld [vmem:[%s4158_s30 + $0x90] sm:$0xff]  ;;  %v4185_v42 = vld [vmem:[%s4158_s30 + $0x98] sm:$0xff]  ;;  %v254_v43 = vld [vmem:[%s4158_s30 + $0x80] sm:$0xff]  ;;  %p3864_p11 = pnand %p3863_p8, %p5325_p9  ;;  %s3866_s21 = sshll.u32 %s4013_s11, 4  ;;  %s3867_s21 = int_to_ptr.vmem [resolvable:$false] %s3866_s21 }
  0x43   : > { %506 = vadd.xlane.f32.xlu1 %v505_v12  ;;  %v307_v35 = vmax.f32 %v305_v24, %v252_v30  ;;  %v306_v37 = vmax.f32 %v304_v26, %v250_v32  ;;  %v378_v40 = vadd.f32 %v377_v28, %v244_v6  ;;  %v4191_v49 = vld [vmem:[%s4158_s30 + $0xa8] sm:$0xff]  ;;  %v517_v51 = vadd.f32 %v253_v31, %v252_v30  ;;  %v4194_v52 = vld [vmem:[%s4158_s30 + $0xb0] sm:$0xff]  ;;  %v4197_v53 = vld [vmem:[%s4158_s30 + $0xb8] sm:$0xff]  ;;  %s3868_s22 = scalar_lea.vmem %s3867_s21, 64  ;;  %p3869_p6 = scmp.lt.s32.totalorder %s5084_s9, %s3867_s21 }
  0x44   : > { %v415_v34 = vadd.f32 %v414_v23, %v245_v7  ;;  %v344_v36 = vmax.f32 %v342_v25, %v253_v31  ;;  %500 = vadd.xlane.f32.xlu0 %v499_v19  ;;  %v345_v44 = vmax.f32 %v343_v33, %v255_v38  ;;  %v4200_v54 = vld [vmem:[%s4158_s30 + $0xa0] sm:$0xff]  ;;  %v4207_v60 = vld [vmem:[%s4158_s30 + $0xc8] sm:$0xff]  ;;  %v514_v61 = vadd.f32 %v251_v27, %v250_v32  ;;  %v4210_v63 = vld [vmem:[%s4158_s30 + $0xd0] sm:$0xff]  ;;  %p3865_p0 = pneg %p3864_p11  ;;  %p3870_p13 = scmp.lt.s32.totalorder %s3868_s22, %s3862_s7 }
  0x45   : > { %v309_v46 = vmax.f32 %v307_v35, %v4182_v41  ;;  %v308_v48 = vmax.f32 %v306_v37, %v254_v43  ;;  %v379_v50 = vadd.f32 %v378_v40, %v246_v21  ;;  %v4213_v0 = vld [vmem:[%s4158_s30 + $0xd8] sm:$0xff]  ;;  %v4216_v1 = vld [vmem:[%s4158_s30 + $0xc0] sm:$0xff]  ;;  %v4223_v7 = vld [vmem:[%s4158_s30 + $0xe8] sm:$0xff]  ;;  %v523_v9 = vadd.f32 %v4185_v42, %v4182_v41 }
  0x46   : > { %v416_v45 = vadd.f32 %v415_v34, %v247_v18  ;;  %v346_v47 = vmax.f32 %v344_v36, %v4185_v42  ;;  %v347_v55 = vmax.f32 %v345_v44, %v4191_v49  ;;  %v4228_v10 = vld [vmem:[%s4158_s30 + $0xf0] sm:$0xff]  ;;  %v4231_v11 = vld [vmem:[%s4158_s30 + $0xf8] sm:$0xff]  ;;  %v4234_v12 = vld [vmem:[%s4158_s30 + $0xe0] sm:$0xff]  ;;  %v520_v19 = vadd.f32 %v255_v38, %v254_v43  ;;  %p3871_p2 = por %p3870_p13, %p3869_p6 }
  0x47   : > { %512 = vadd.xlane.f32.xlu1 %v511_v29  ;;  %v311_v57 = vmax.f32 %v309_v46, %v4194_v52  ;;  %v310_v59 = vmax.f32 %v308_v48, %v4200_v54  ;;  %v380_v62 = vadd.f32 %v379_v50, %v248_v16  ;;  %v4241_v18 = vld [vmem:[%s4158_s30 + $0x108] sm:$0xff]  ;;  %v4244_v21 = vld [vmem:[%s4158_s30 + $0x110] sm:$0xff]  ;;  %v4247_v22 = vld [vmem:[%s4158_s30 + $0x118] sm:$0xff] }
  0x48   : > { %v417_v56 = vadd.f32 %v416_v45, %v249_v17  ;;  %v348_v58 = vmax.f32 %v346_v47, %v4197_v53  ;;  %509 = vadd.xlane.f32.xlu0 %v508_v39  ;;  %v349_v2 = vmax.f32 %v347_v55, %v4207_v60  ;;  %v4250_v23 = vld [vmem:[%s4158_s30 + $0x100] sm:$0xff]  ;;  %v4257_v29 = vld [vmem:[%s4158_s30 + $0x128] sm:$0xff]  ;;  %v4265_v33 = vld [vmem:[%s4158_s30 + $0x138] sm:$0xff]  ;;  %p3872_p5 = pnand %p3871_p2, %p3865_p0 }
  0x49   : > { %v313_v4 = vmax.f32 %v311_v57, %v4210_v63  ;;  %v312_v6 = vmax.f32 %v310_v59, %v4216_v1  ;;  %v381_v8 = vadd.f32 %v380_v62, %v250_v32  ;;  %v4262_v32 = vld [vmem:[%s4158_s30 + $0x130] sm:$0xff]  ;;  %v4268_v34 = vld [vmem:[%s4158_s30 + $0x120] sm:$0xff]  ;;  %v4276_v40 = vld [vmem:[%s4158_s30 + $0x148] sm:$0xff]  ;;  %v535_v57 = vadd.f32 %v4213_v0, %v4210_v63 }
  0x4a   : > { %v418_v3 = vadd.f32 %v417_v56, %v251_v27  ;;  %v350_v5 = vmax.f32 %v348_v58, %v4213_v0  ;;  %v351_v13 = vmax.f32 %v349_v2, %v4223_v7  ;;  %v4282_v45 = vld [vmem:[%s4158_s30 + $0x150] sm:$0xff]  ;;  %v4288_v46 = vld [vmem:[%s4158_s30 + $0x140] sm:$0xff]  ;;  %v4296_v56 = vld [vmem:[%s4158_s30 + $0x168] sm:$0xff] }
  0x4b   : > { %518 = vadd.xlane.f32.xlu1 %v517_v51  ;;  %v315_v15 = vmax.f32 %v313_v4, %v4228_v10  ;;  %v314_v17 = vmax.f32 %v312_v6, %v4234_v12  ;;  %v382_v20 = vadd.f32 %v381_v8, %v252_v30  ;;  %v4302_v58 = vld [vmem:[%s4158_s30 + $0x170] sm:$0xff]  ;;  %v4308_v59 = vld [vmem:[%s4158_s30 + $0x160] sm:$0xff]  ;;  %v4316_v4 = vld [vmem:[%s4158_s30 + $0x188] sm:$0xff] }
  0x4c   : > { %v419_v14 = vadd.f32 %v418_v3, %v253_v31  ;;  %v352_v16 = vmax.f32 %v350_v5, %v4231_v11  ;;  %515 = vadd.xlane.f32.xlu0 %v514_v61  ;;  %v353_v24 = vmax.f32 %v351_v13, %v4241_v18  ;;  %v529_v31 = vadd.f32 %v4197_v53, %v4194_v52  ;;  %v4322_v8 = vld [vmem:[%s4158_s30 + $0x190] sm:$0xff] }
  0x4d   : > { %v317_v26 = vmax.f32 %v315_v15, %v4244_v21  ;;  %v316_v28 = vmax.f32 %v314_v17, %v4250_v23  ;;  %v383_v30 = vadd.f32 %v382_v20, %v254_v43  ;;  %v526_v43 = vadd.f32 %v4191_v49, %v4200_v54 }
  0x4e   : > { %v420_v25 = vadd.f32 %v419_v14, %v255_v38  ;;  %v354_v27 = vmax.f32 %v352_v16, %v4247_v22  ;;  %v355_v35 = vmax.f32 %v353_v24, %v4257_v29  ;;  %v532_v5 = vadd.f32 %v4207_v60, %v4216_v1  ;;  %v4342_v24 = vld [vmem:[%s4158_s30 + $0x1a0] sm:$0xff] }
  0x4f   : > { %524 = vadd.xlane.f32.xlu1 %v523_v9  ;;  %v319_v37 = vmax.f32 %v317_v26, %v4262_v32  ;;  %v318_v39 = vmax.f32 %v316_v28, %v4268_v34  ;;  %v384_v44 = vadd.f32 %v383_v30, %v4182_v41  ;;  %v4328_v9 = vld [vmem:[%s4158_s30 + $0x180] sm:$0xff]  ;;  %v541_v20 = vadd.f32 %v4231_v11, %v4228_v10  ;;  %v4349_v26 = vld [vmem:[%s4158_s30 + $0x1b8] sm:$0xff] }
  0x50   : > { %v421_v36 = vadd.f32 %v420_v25, %v4185_v42  ;;  %v356_v38 = vmax.f32 %v354_v27, %v4265_v33  ;;  %521 = vadd.xlane.f32.xlu0 %v520_v19  ;;  %v4285_v42 = vld [vmem:[%s4158_s30 + $0x158] sm:$0xff]  ;;  %v357_v47 = vmax.f32 %v355_v35, %v4276_v40  ;;  %v4336_v19 = vld [vmem:[%s4158_s30 + $0x1a8] sm:$0xff]  ;;  %v4346_v25 = vld [vmem:[%s4158_s30 + $0x1b0] sm:$0xff]  ;;  %v538_v35 = vadd.f32 %v4223_v7, %v4234_v12 }
  0x51   : > { %v321_v50 = vmax.f32 %v319_v37, %v4282_v45  ;;  %v320_v55 = vmax.f32 %v318_v39, %v4288_v46  ;;  %v385_v41 = vadd.f32 %v384_v44, %v4200_v54  ;;  %v4362_v37 = vld [vmem:[%s4158_s30 + $0x1c0] sm:$0xff]  ;;  %v4369_v39 = vld [vmem:[%s4158_s30 + $0x1d8] sm:$0xff] }
  0x52   : > { %v422_v48 = vadd.f32 %v421_v36, %v4191_v49  ;;  %v358_v51 = vmax.f32 %v356_v38, %v4285_v42  ;;  %v4305_v49 = vld [vmem:[%s4158_s30 + $0x178] sm:$0xff]  ;;  %v359_v61 = vmax.f32 %v357_v47, %v4296_v56  ;;  %v4366_v38 = vld [vmem:[%s4158_s30 + $0x1d0] sm:$0xff] }
  0x53   : > { %530 = vadd.xlane.f32.xlu1 %v529_v31  ;;  %v323_v2 = vmax.f32 %v321_v50, %v4302_v58  ;;  %v322_v3 = vmax.f32 %v320_v55, %v4308_v59  ;;  %v386_v6 = vadd.f32 %v385_v41, %v4194_v52  ;;  %v4356_v31 = vld [vmem:[%s4158_s30 + $0x1c8] sm:$0xff]  ;;  %v4382_v55 = vld [vmem:[%s4158_s30 + $0x1e0] sm:$0xff] }
  0x54   : > { %v423_v62 = vadd.f32 %v422_v48, %v4197_v53  ;;  %v360_v54 = vmax.f32 %v358_v51, %v4305_v49  ;;  %527 = vadd.xlane.f32.xlu0 %v526_v43  ;;  %v4325_v53 = vld [vmem:[%s4158_s30 + $0x198] sm:$0xff]  ;;  %v361_v13 = vmax.f32 %v359_v61, %v4316_v4  ;;  %v4376_v50 = vld [vmem:[%s4158_s30 + $0x1e8] sm:$0xff]  ;;  %v547_v51 = vadd.f32 %v4247_v22, %v4244_v21 }
  0x55   : > { %v325_v15 = vmax.f32 %v323_v2, %v4322_v8  ;;  %v324_v17 = vmax.f32 %v322_v3, %v4328_v9  ;;  %v387_v52 = vadd.f32 %v386_v6, %v4216_v1 }
  0x56   : > { %v424_v14 = vadd.f32 %v423_v62, %v4207_v60  ;;  %v362_v16 = vmax.f32 %v360_v54, %v4325_v53  ;;  %v363_v60 = vmax.f32 %v361_v13, %v4336_v19  ;;  %v544_v54 = vadd.f32 %v4241_v18, %v4250_v23 }
  0x57   : > { %536 = vadd.xlane.f32.xlu1 %v535_v57  ;;  %v326_v28 = vmax.f32 %v324_v17, %v4342_v24  ;;  %v327_v1 = vmax.f32 %v325_v15, %v4346_v25  ;;  %v388_v36 = vadd.f32 %v387_v52, %v4210_v63  ;;  %v4386_v57 = vld [vmem:[%s4158_s30 + $0x1f0] sm:$0xff]  ;;  %v553_v15 = vadd.f32 %v4265_v33, %v4262_v32 }
  0x58   : > { %v425_v27 = vadd.f32 %v424_v14, %v4213_v0  ;;  %v364_v30 = vmax.f32 %v362_v16, %v4349_v26  ;;  %533 = vadd.xlane.f32.xlu0 %v532_v5  ;;  %v365_v0 = vmax.f32 %v363_v60, %v4356_v31  ;;  %v4009_v14 = vmov 0  }
  0x59   : > { %v328_v44 = vmax.f32 %v326_v28, %v4362_v37  ;;  %v329_v47 = vmax.f32 %v327_v1, %v4366_v38  ;;  %v389_v63 = vadd.f32 %v388_v36, %v4234_v12  ;;  %3830 = vset.pattern.permute.xlu0 %v4009_v14  ;;  %3831 = vset.pattern.permute.xlu1 %v4009_v14 }
  0x5a   : > { %v426_v43 = vadd.f32 %v425_v27, %v4223_v7  ;;  %v366_v48 = vmax.f32 %v364_v30, %v4369_v39  ;;  %v367_v41 = vmax.f32 %v365_v0, %v4376_v50  ;;  %v4389_v7 = vld [vmem:[%s4158_s30 + $0x1f8] sm:$0xff]  ;;  %v559_v28 = vadd.f32 %v4285_v42, %v4282_v45 }
  0x5b   : > { %542 = vadd.xlane.f32.xlu1 %v541_v20  ;;  %v330_v62 = vmax.f32 %v328_v44, %v4382_v55  ;;  %v331_v2 = vmax.f32 %v329_v47, %v4386_v57  ;;  %v390_v3 = vadd.f32 %v389_v63, %v4228_v10  ;;  %v550_v10 = vadd.f32 %v4257_v29, %v4268_v34 }
  0x5c   : > { %v427_v61 = vadd.f32 %v426_v43, %v4231_v11  ;;  %v368_v12 = vmax.f32 %v366_v48, %v4389_v7  ;;  %539 = vadd.xlane.f32.xlu0 %v538_v35  ;;  %v556_v35 = vadd.f32 %v4276_v40, %v4288_v46  ;;  %v565_v43 = vadd.f32 %v4305_v49, %v4302_v58 }
  0x5d   : > { %v332_v6 = vmax.f32 %v330_v62, %v331_v2  ;;  %v391_v11 = vadd.f32 %v390_v3, %v4250_v23  ;;  %v562_v48 = vadd.f32 %v4296_v56, %v4308_v59 }
  0x5e   : > { %v428_v5 = vadd.f32 %v427_v61, %v4241_v18  ;;  %v369_v13 = vmax.f32 %v367_v41, %v368_v12  ;;  %v577_v12 = vadd.f32 %v4349_v26, %v4346_v25 }
  0x5f   : > { %548 = vadd.xlane.f32.xlu1 %v547_v51  ;;  %v333_v17 = vrot.slane %v332_v6, 4  ;;  %v392_v18 = vadd.f32 %v391_v11, %v4244_v21 }
  0x60   : > { %v429_v16 = vadd.f32 %v428_v5, %v4247_v22  ;;  %v370_v52 = vrot.slane %v369_v13, 4  ;;  %545 = vadd.xlane.f32.xlu0 %v544_v54  ;;  %v580_v5 = vadd.f32 %v4356_v31, %v4362_v37 }
  0x61   : > { %v334_v60 = vmax.f32 %v332_v6, %v333_v17  ;;  %v393_v23 = vadd.f32 %v392_v18, %v4268_v34 }
  0x62   : > { %v430_v20 = vadd.f32 %v429_v16, %v4257_v29  ;;  %v371_v27 = vmax.f32 %v369_v13, %v370_v52  ;;  %v586_v13 = vadd.f32 %v4376_v50, %v4382_v55 }
  0x63   : > { %554 = vadd.xlane.f32.xlu1 %v553_v15  ;;  %v335_v1 = vrot.slane %v334_v60, 2  ;;  %v394_v21 = vadd.f32 %v393_v23, %v4262_v32 }
  0x64   : > { %v431_v22 = vadd.f32 %v430_v20, %v4265_v33  ;;  %v372_v30 = vrot.slane %v371_v27, 2  ;;  %551 = vadd.xlane.f32.xlu0 %v550_v10 }
  0x65   : > { %v336_v36 = vmax.f32 %v334_v60, %v335_v1  ;;  %v395_v34 = vadd.f32 %v394_v21, %v4288_v46 }
  0x66   : > { %v432_v29 = vadd.f32 %v431_v22, %v4276_v40  ;;  %v373_v0 = vmax.f32 %v371_v27, %v372_v30  ;;  %v4010_v27 = vmov 1966171168  }
  0x67   : > { %560 = vadd.xlane.f32.xlu1 %v559_v28  ;;  %v337_v44 = vrot.slane %v336_v36, 1  ;;  %v396_v32 = vadd.f32 %v395_v34, %v4282_v45  ;;  %v568_v45 = vadd.f32 %v4316_v4, %v4328_v9 }
  0x68   : > { %v433_v33 = vadd.f32 %v432_v29, %v4285_v42  ;;  %v374_v47 = vrot.slane %v373_v0, 1  ;;  %557 = vadd.xlane.f32.xlu0 %v556_v35  ;;  %v571_v42 = vadd.f32 %v4325_v53, %v4322_v8 }
  0x69   : > { %v4423_v63 = vmax.f32 %v336_v36, %v337_v44  ;;  %v397_v46 = vadd.f32 %v396_v32, %v4308_v59 }
  0x6a   : > { %v434_v40 = vadd.f32 %v433_v33, %v4296_v56  ;;  %v4425_v51 = vmax.f32 %v373_v0, %v374_v47 }
  0x6b   : > { %566 = vadd.xlane.f32.xlu1 %v565_v43  ;;  %v398_v56 = vadd.f32 %v397_v46, %v4302_v58 }
  0x6c   : > { %v435_v41 = vadd.f32 %v434_v40, %v4305_v49  ;;  %v453_v61 = vcombine.low %v4423_v63, %v4425_v51  ;;  %563 = vadd.xlane.f32.xlu0 %v562_v48  ;;  %v574_v49 = vadd.f32 %v4336_v19, %v4342_v24 }
  0x6d   : > { %v399_v2 = vadd.f32 %v398_v56, %v4328_v9  ;;  %v583_v9 = vadd.f32 %v4369_v39, %v4366_v38 }
  0x6e   : > { %v436_v62 = vadd.f32 %v435_v41, %v4316_v4 }
  0x6f   : > { %572 = vadd.xlane.f32.xlu1 %v571_v42  ;;  %v400_v54 = vadd.f32 %v399_v2, %v4322_v8 }
  0x70   : > { %v437_v59 = vadd.f32 %v436_v62, %v4325_v53  ;;  %569 = vadd.xlane.f32.xlu0 %v568_v45 }
  0x71   : > { %v401_v58 = vadd.f32 %v400_v54, %v4342_v24  ;;  %v589_v24 = vadd.f32 %v4389_v7, %v4386_v57 }
  0x72   : > { %v438_v3 = vadd.f32 %v437_v59, %v4336_v19 }
  0x73   : > { %578 = vadd.xlane.f32.xlu1 %v577_v12  ;;  %v402_v53 = vadd.f32 %v401_v58, %v4346_v25 }
  0x74   : > { %v439_v4 = vadd.f32 %v438_v3, %v4349_v26  ;;  %575 = vadd.xlane.f32.xlu0 %v574_v49 }
  0x75   : > { %v403_v8 = vadd.f32 %v402_v53, %v4362_v37 }
  0x76   : > { %v440_v6 = vadd.f32 %v439_v4, %v4356_v31 }
  0x77   : > { %584 = vadd.xlane.f32.xlu1 %v583_v9  ;;  %v404_v26 = vadd.f32 %v403_v8, %v4366_v38 }
  0x78   : > { %v441_v19 = vadd.f32 %v440_v6, %v4369_v39  ;;  %581 = vadd.xlane.f32.xlu0 %v580_v5 }
  0x79   : > { %v405_v14 = vadd.f32 %v404_v26, %v4382_v55 }
  0x7a   : > { %v442_v25 = vadd.f32 %v441_v19, %v4376_v50 }
  0x7b   : > { %590 = vadd.xlane.f32.xlu1 %v589_v24  ;;  %v406_v37 = vadd.f32 %v405_v14, %v4386_v57  ;;  %v455_v57 = vunpack.c.l.s4 %v4010_v27 }
  0x7c   : > { %v443_v31 = vadd.f32 %v442_v25, %v4389_v7  ;;  %587 = vadd.xlane.f32.xlu0 %v586_v13  ;;  %v232_v7 = vlaneseq }
  0x7d   : > { %v407_v11 = vrot.slane %v406_v37, 4  ;;  %v456_v28 = vunpack.c.0.s8 %v455_v57 }
  0x7e   : > { %v444_v39 = vrot.slane %v443_v31, 4  ;;  %v4471_v23 = vshrl.u32 %v232_v7, 7  ;;  %vm5052_vm0 = vcmp.lt.s32.totalorder %v232_v7, 256 }
  0x7f   : > { %v408_v16 = vadd.f32 %v407_v11, %v406_v37 }
  0x80   : > { %v445_v15 = vadd.f32 %v444_v39, %v443_v31  ;;  %v4474_v22 = vsub.s32 0, %v4471_v23  ;;  %v4477_v1 = vsub.s32 1, %v4471_v23  ;;  %v4480_v30 = vsub.s32 2, %v4471_v23 }
  0x81   : > { %v409_v52 = vrot.slane %v408_v16, 2  ;;  %v4483_v35 = vsub.s32 3, %v4471_v23  ;;  %v4486_v21 = vsub.s32 4, %v4471_v23  ;;  %v4489_v29 = vsub.s32 5, %v4471_v23 }
  0x82   : > { %v446_v17 = vrot.slane %v445_v15, 2  ;;  %v4492_v36 = vsub.s32 6, %v4471_v23  ;;  %v4495_v0 = vsub.s32 7, %v4471_v23  ;;  %v4498_v34 = vsub.s32 %v456_v28, %v4471_v23 }
  0x83   : > { %v410_v10 = vadd.f32 %v409_v52, %v408_v16 }
  0x84   : > { %v447_v38 = vadd.f32 %v446_v17, %v445_v15 }
  0x85   : > { %v411_v20 = vrot.slane %v410_v10, 1 }
  0x86   : > { %v448_v18 = vrot.slane %v447_v38, 1 }
  0x87   : > { %v4466_v50 = vadd.f32 %v411_v20, %v410_v10 }
  0x88   : > { %v4464_v60 = vadd.f32 %v448_v18, %v447_v38 }
  0x8a   : > { %v478_v55 = vcombine.low %v4466_v50, %v4464_v60 }
  0xcc   : > { %v504_v43 = vpop.xlane.xlu1 %503 }
  0xcd   : > { %v498_v33 = vpop.xlane.xlu0 %497  ;;  %v691_v44 = vrot.slane %v504_v43, %v4474_v22  ;;  %v695_v47 = vrot.slane %v504_v43, %v4477_v1  ;;  %v699_v48 = vrot.slane %v504_v43, %v4480_v30  ;;  %v703_v32 = vrot.slane %v504_v43, %v4483_v35 }
  0xce   : > { %v627_v40 = vrot.slane %v498_v33, %v4474_v22  ;;  %v631_v46 = vrot.slane %v498_v33, %v4477_v1  ;;  %v635_v42 = vrot.slane %v498_v33, %v4480_v30  ;;  %v639_v41 = vrot.slane %v498_v33, %v4483_v35 }
  0xcf   : > { %v643_v45 = vrot.slane %v498_v33, %v4486_v21  ;;  %v647_v56 = vrot.slane %v498_v33, %v4489_v29  ;;  %v651_v62 = vrot.slane %v498_v33, %v4492_v36  ;;  %v655_v2 = vrot.slane %v498_v33, %v4495_v0 }
  0xd0   : > { %v4512_v59 = vpop.xlane.xlu1 %506  ;;  %v1648_v12 = vcombine.low %v627_v40, %v631_v46  ;;  %v1649_v49 = vcombine.low %v635_v42, %v639_v41  ;;  %v707_v54 = vrot.slane %v504_v43, %v4486_v21  ;;  %v711_v3 = vrot.slane %v504_v43, %v4489_v29 }
  0xd1   : > { %v501_v58 = vpop.xlane.xlu0 %500  ;;  %v1650_v4 = vcombine.low %v643_v45, %v647_v56  ;;  %v1651_v9 = vcombine.low %v651_v62, %v655_v2  ;;  %v715_v53 = vrot.slane %v504_v43, %v4492_v36  ;;  %v719_v5 = vrot.slane %v504_v43, %v4495_v0 }
  0xd2   : > { %v1658_v6 = vrot.slane %v1648_v12, %v4498_v34  ;;  %v1665_v8 = vrot.slane %v1649_v49, %v4498_v34  ;;  %v659_v19 = vrot.slane %v501_v58, %v4474_v22  ;;  %v663_v24 = vrot.slane %v501_v58, %v4477_v1 }
  0xd3   : > { %v1672_v26 = vrot.slane %v1650_v4, %v4498_v34  ;;  %v1679_v13 = vrot.slane %v1651_v9, %v4498_v34  ;;  %v667_v25 = vrot.slane %v501_v58, %v4480_v30  ;;  %v671_v14 = vrot.slane %v501_v58, %v4483_v35 }
  0xd4   : > { %v4526_v31 = vpop.xlane.xlu1 %512  ;;  %v1680_v37 = vcombine.low %v1658_v6, %v1665_v8  ;;  %v675_v39 = vrot.slane %v501_v58, %v4486_v21  ;;  %v679_v11 = vrot.slane %v501_v58, %v4489_v29  ;;  %v683_v15 = vrot.slane %v501_v58, %v4492_v36 }
  0xd5   : > { %v1681_v16 = vcombine.low %v1672_v26, %v1679_v13  ;;  %v687_v17 = vrot.slane %v501_v58, %v4495_v0  ;;  %v1697_v52 = vcombine.low %v659_v19, %v663_v24  ;;  %v1698_v38 = vcombine.low %v667_v25, %v671_v14  ;;  %v510_v26 = vpop.xlane.xlu0 %509 }
  0xd6   : > { %v1688_v10 = vrot.slane %v1680_v37, %v4498_v34  ;;  %v1699_v18 = vcombine.low %v675_v39, %v679_v11  ;;  %v1746_v20 = vcombine.low %v691_v44, %v695_v47  ;;  %v1747_v27 = vcombine.low %v699_v48, %v703_v32 }
  0xd7   : > { %v1695_v57 = vrot.slane %v1681_v16, %v4498_v34  ;;  %v1700_v28 = vcombine.low %v683_v15, %v687_v17  ;;  %v1707_v43 = vrot.slane %v1697_v52, %v4498_v34  ;;  %v1714_v33 = vrot.slane %v1698_v38, %v4498_v34 }
  0xd8   : > { %v4536_v40 = vpop.xlane.xlu1 %518  ;;  %v1721_v46 = vrot.slane %v1699_v18, %v4498_v34  ;;  %v1748_v42 = vcombine.low %v707_v54, %v711_v3  ;;  %v1749_v41 = vcombine.low %v715_v53, %v719_v5  ;;  %v1756_v45 = vrot.slane %v1746_v20, %v4498_v34 }
  0xd9   : > { %v1696_v56 = vcombine.low %v1688_v10, %v1695_v57  ;;  %v1728_v62 = vrot.slane %v1700_v28, %v4498_v34  ;;  %v1729_v44 = vcombine.low %v1707_v43, %v1714_v33  ;;  %v1763_v47 = vrot.slane %v1747_v27, %v4498_v34 }
  0xda   : > { %v1770_v48 = vrot.slane %v1748_v42, %v4498_v34  ;;  %v1777_v32 = vrot.slane %v1749_v41, %v4498_v34  ;;  %v723_v2 = vrot.slane %v4512_v59, %v4474_v22  ;;  %v727_v12 = vrot.slane %v4512_v59, %v4477_v1 }
  0xdb   : > { %3217 = vperm.xlu0 %3830, %v1696_v56   ;;  %v1730_v49 = vcombine.low %v1721_v46, %v1728_v62  ;;  %v1737_v54 = vrot.slane %v1729_v44, %v4498_v34  ;;  %v1778_v3 = vcombine.low %v1756_v45, %v1763_v47  ;;  %v731_v58 = vrot.slane %v4512_v59, %v4480_v30 }
  0xdc   : > { %v1779_v4 = vcombine.low %v1770_v48, %v1777_v32  ;;  %v735_v9 = vrot.slane %v4512_v59, %v4483_v35  ;;  %v739_v53 = vrot.slane %v4512_v59, %v4486_v21  ;;  %v743_v5 = vrot.slane %v4512_v59, %v4489_v29  ;;  %v525_v13 = vpop.xlane.xlu1 %524 }
  0xdd   : > { %v1744_v6 = vrot.slane %v1730_v49, %v4498_v34  ;;  %v1786_v8 = vrot.slane %v1778_v3, %v4498_v34  ;;  %v747_v19 = vrot.slane %v4512_v59, %v4492_v36  ;;  %v751_v24 = vrot.slane %v4512_v59, %v4495_v0 }
  0xde   : > { %v1793_v25 = vrot.slane %v1779_v4, %v4498_v34  ;;  %v1795_v14 = vcombine.low %v723_v2, %v727_v12  ;;  %v1796_v37 = vcombine.low %v731_v58, %v735_v9  ;;  %v1797_v39 = vcombine.low %v739_v53, %v743_v5 }
  0xdf   : > { %v1745_v11 = vcombine.low %v1737_v54, %v1744_v6  ;;  %v1798_v15 = vcombine.low %v747_v19, %v751_v24  ;;  %v755_v16 = vrot.slane %v510_v26, %v4474_v22  ;;  %v759_v17 = vrot.slane %v510_v26, %v4477_v1 }
  0xe0   : > { %v1794_v52 = vcombine.low %v1786_v8, %v1793_v25  ;;  %v1805_v38 = vrot.slane %v1795_v14, %v4498_v34  ;;  %v1812_v10 = vrot.slane %v1796_v37, %v4498_v34  ;;  %v1819_v59 = vrot.slane %v1797_v39, %v4498_v34  ;;  %v4577_v62 = vpop.xlane.xlu1 %530 }
  0xe1   : > { %3220 = vperm.xlu1 %3831, %v1745_v11   ;;  %v1826_v18 = vrot.slane %v1798_v15, %v4498_v34  ;;  %v763_v20 = vrot.slane %v510_v26, %v4480_v30  ;;  %v767_v27 = vrot.slane %v510_v26, %v4483_v35  ;;  %v771_v57 = vrot.slane %v510_v26, %v4486_v21  ;;  %v516_v15 = vpop.xlane.xlu0 %515 }
  0xe2   : > { %v1827_v28 = vcombine.low %v1805_v38, %v1812_v10  ;;  %v775_v43 = vrot.slane %v510_v26, %v4489_v29  ;;  %v779_v33 = vrot.slane %v510_v26, %v4492_v36  ;;  %v783_v46 = vrot.slane %v510_v26, %v4495_v0 }
  0xe3   : > { %v1828_v42 = vcombine.low %v1819_v59, %v1826_v18  ;;  %v1844_v41 = vcombine.low %v755_v16, %v759_v17  ;;  %v1845_v45 = vcombine.low %v763_v20, %v767_v27  ;;  %v915_v56 = vrot.slane %v525_v13, %v4474_v22 }
  0xe4   : > { %v1835_v44 = vrot.slane %v1827_v28, %v4498_v34  ;;  %v1846_v47 = vcombine.low %v771_v57, %v775_v43  ;;  %v1847_v48 = vcombine.low %v779_v33, %v783_v46  ;;  %v919_v32 = vrot.slane %v525_v13, %v4477_v1  ;;  %v4597_v16 = vpop.xlane.xlu1 %536 }
  0xe5   : > { %3223 = vperm.xlu1 %3831, %v1794_v52   ;;  %v1842_v2 = vrot.slane %v1828_v42, %v4498_v34  ;;  %v1854_v12 = vrot.slane %v1844_v41, %v4498_v34  ;;  %v1861_v49 = vrot.slane %v1845_v45, %v4498_v34  ;;  %v923_v54 = vrot.slane %v525_v13, %v4480_v30 }
  0xe6   : > { %v1868_v3 = vrot.slane %v1846_v47, %v4498_v34  ;;  %v1875_v58 = vrot.slane %v1847_v48, %v4498_v34  ;;  %v927_v4 = vrot.slane %v525_v13, %v4483_v35  ;;  %v931_v9 = vrot.slane %v525_v13, %v4486_v21 }
  0xe7   : > { %v1843_v53 = vcombine.low %v1835_v44, %v1842_v2  ;;  %v1876_v5 = vcombine.low %v1854_v12, %v1861_v49  ;;  %v935_v6 = vrot.slane %v525_v13, %v4489_v29  ;;  %v939_v8 = vrot.slane %v525_v13, %v4492_v36  ;;  %v4621_v49 = vpop.xlane.xlu0 %521 }
  0xe8   : > { %v1877_v19 = vcombine.low %v1868_v3, %v1875_v58  ;;  %v943_v24 = vrot.slane %v525_v13, %v4495_v0  ;;  %v2089_v26 = vcombine.low %v915_v56, %v919_v32  ;;  %v2090_v25 = vcombine.low %v923_v54, %v927_v4  ;;  %v4623_v54 = vpop.xlane.xlu1 %542 }
  0xe9   : > { %3226 = vperm.xlu1 %3831, %v1843_v53   ;;  %v1884_v14 = vrot.slane %v1876_v5, %v4498_v34  ;;  %v2091_v37 = vcombine.low %v931_v9, %v935_v6  ;;  %v787_v39 = vrot.slane %v4526_v31, %v4474_v22  ;;  %v791_v11 = vrot.slane %v4526_v31, %v4477_v1 }
  0xea   : > { %v1891_v17 = vrot.slane %v1877_v19, %v4498_v34  ;;  %v2092_v52 = vcombine.low %v939_v8, %v943_v24  ;;  %v2099_v13 = vrot.slane %v2089_v26, %v4498_v34  ;;  %v2106_v38 = vrot.slane %v2090_v25, %v4498_v34 }
  0xeb   : > { %v2113_v10 = vrot.slane %v2091_v37, %v4498_v34  ;;  %v795_v59 = vrot.slane %v4526_v31, %v4480_v30  ;;  %v799_v18 = vrot.slane %v4526_v31, %v4483_v35  ;;  %v803_v20 = vrot.slane %v4526_v31, %v4486_v21 }
  0xec   : > { %v1892_v27 = vcombine.low %v1884_v14, %v1891_v17  ;;  %v2120_v57 = vrot.slane %v2092_v52, %v4498_v34  ;;  %v2121_v28 = vcombine.low %v2099_v13, %v2106_v38  ;;  %v807_v43 = vrot.slane %v4526_v31, %v4489_v29 }
  0xed   : > { %v811_v33 = vrot.slane %v4526_v31, %v4492_v36  ;;  %v815_v46 = vrot.slane %v4526_v31, %v4495_v0  ;;  %v1893_v42 = vcombine.low %v787_v39, %v791_v11  ;;  %v1894_v41 = vcombine.low %v795_v59, %v799_v18  ;;  %v4645_v18 = vpop.xlane.xlu0 %527 }
  0xee   : > { %3229 = vperm.xlu1 %3831, %v1892_v27   ;;  %v2122_v45 = vcombine.low %v2113_v10, %v2120_v57  ;;  %v2129_v56 = vrot.slane %v2121_v28, %v4498_v34  ;;  %v1895_v44 = vcombine.low %v803_v20, %v807_v43  ;;  %v819_v47 = vrot.slane %v516_v15, %v4474_v22  ;;  %v549_v20 = vpop.xlane.xlu1 %548 }
  0xef   : > { %v1896_v48 = vcombine.low %v811_v33, %v815_v46  ;;  %v1903_v32 = vrot.slane %v1893_v42, %v4498_v34  ;;  %v1910_v2 = vrot.slane %v1894_v41, %v4498_v34  ;;  %v823_v12 = vrot.slane %v516_v15, %v4477_v1 }
  0xf0   : > { %v2136_v31 = vrot.slane %v2122_v45, %v4498_v34  ;;  %v1917_v3 = vrot.slane %v1895_v44, %v4498_v34  ;;  %v827_v58 = vrot.slane %v516_v15, %v4480_v30  ;;  %v831_v4 = vrot.slane %v516_v15, %v4483_v35 }
  0xf1   : > { %v1924_v9 = vrot.slane %v1896_v48, %v4498_v34  ;;  %v1925_v53 = vcombine.low %v1903_v32, %v1910_v2  ;;  %v835_v5 = vrot.slane %v516_v15, %v4486_v21  ;;  %v839_v6 = vrot.slane %v516_v15, %v4489_v29 }
  0xf2   : > { %v2137_v8 = vcombine.low %v2129_v56, %v2136_v31  ;;  %v843_v19 = vrot.slane %v516_v15, %v4492_v36  ;;  %v847_v24 = vrot.slane %v516_v15, %v4495_v0  ;;  %v1942_v26 = vcombine.low %v819_v47, %v823_v12 }
  0xf3   : > { %v1926_v25 = vcombine.low %v1917_v3, %v1924_v9  ;;  %v1933_v14 = vrot.slane %v1925_v53, %v4498_v34  ;;  %v1943_v37 = vcombine.low %v827_v58, %v831_v4  ;;  %v1944_v39 = vcombine.low %v835_v5, %v839_v6  ;;  %v4669_v6 = vpop.xlane.xlu0 %533 }
  0xf4   : > { %3244 = vperm.xlu0 %3830, %v2137_v8   ;;  %v1945_v11 = vcombine.low %v843_v19, %v847_v24  ;;  %v1952_v17 = vrot.slane %v1942_v26, %v4498_v34  ;;  %v851_v52 = vrot.slane %v4536_v40, %v4474_v22  ;;  %v855_v13 = vrot.slane %v4536_v40, %v4477_v1 }
  0xf5   : > { %v1940_v38 = vrot.slane %v1926_v25, %v4498_v34  ;;  %v1959_v15 = vrot.slane %v1943_v37, %v4498_v34  ;;  %v1966_v10 = vrot.slane %v1944_v39, %v4498_v34  ;;  %v859_v59 = vrot.slane %v4536_v40, %v4480_v30 }
  0xf6   : > { %v1973_v27 = vrot.slane %v1945_v11, %v4498_v34  ;;  %v863_v57 = vrot.slane %v4536_v40, %v4483_v35  ;;  %v867_v28 = vrot.slane %v4536_v40, %v4486_v21  ;;  %v871_v43 = vrot.slane %v4536_v40, %v4489_v29 }
  0xf7   : > { %v1941_v33 = vcombine.low %v1933_v14, %v1940_v38  ;;  %v1974_v46 = vcombine.low %v1952_v17, %v1959_v15  ;;  %v875_v42 = vrot.slane %v4536_v40, %v4492_v36  ;;  %v879_v41 = vrot.slane %v4536_v40, %v4495_v0 }
  0xf8   : > { %v1975_v45 = vcombine.low %v1966_v10, %v1973_v27  ;;  %v1991_v56 = vcombine.low %v851_v52, %v855_v13  ;;  %v1992_v44 = vcombine.low %v859_v59, %v863_v57  ;;  %v1993_v47 = vcombine.low %v867_v28, %v871_v43 }
  0xf9   : > { %3232 = vperm.xlu1 %3831, %v1941_v33   ;;  %v1982_v48 = vrot.slane %v1974_v46, %v4498_v34  ;;  %v1994_v32 = vcombine.low %v875_v42, %v879_v41  ;;  %v1171_v2 = vrot.slane %v549_v20, %v4474_v22  ;;  %v1175_v12 = vrot.slane %v549_v20, %v4477_v1 }
  0xfa   : > { %v1989_v31 = vrot.slane %v1975_v45, %v4498_v34  ;;  %v2001_v3 = vrot.slane %v1991_v56, %v4498_v34  ;;  %v2008_v58 = vrot.slane %v1992_v44, %v4498_v34  ;;  %v2015_v40 = vrot.slane %v1993_v47, %v4498_v34  ;;  %v4692_v45 = vpop.xlane.xlu0 %539 }
  0xfb   : > { %v2022_v4 = vrot.slane %v1994_v32, %v4498_v34  ;;  %v1179_v9 = vrot.slane %v549_v20, %v4480_v30  ;;  %v1183_v53 = vrot.slane %v549_v20, %v4483_v35  ;;  %v1187_v5 = vrot.slane %v549_v20, %v4486_v21 }
  0xfc   : > { %v1990_v8 = vcombine.low %v1982_v48, %v1989_v31  ;;  %v2023_v19 = vcombine.low %v2001_v3, %v2008_v58  ;;  %v1191_v24 = vrot.slane %v549_v20, %v4489_v29  ;;  %v1195_v26 = vrot.slane %v549_v20, %v4492_v36 }
  0xfd   : > { %v2024_v25 = vcombine.low %v2015_v40, %v2022_v4  ;;  %v1199_v14 = vrot.slane %v549_v20, %v4495_v0  ;;  %v2481_v37 = vcombine.low %v1171_v2, %v1175_v12  ;;  %v2482_v39 = vcombine.low %v1179_v9, %v1183_v53  ;;  %v555_v20 = vpop.xlane.xlu1 %554 }
  0xfe   : > { %3235 = vperm.xlu1 %3831, %v1990_v8   ;;  %v2031_v11 = vrot.slane %v2023_v19, %v4498_v34  ;;  %v2483_v17 = vcombine.low %v1187_v5, %v1191_v24  ;;  %v883_v52 = vrot.slane %v4621_v49, %v4474_v22  ;;  %v887_v13 = vrot.slane %v4621_v49, %v4477_v1 }
  0xff   : > { %v2038_v38 = vrot.slane %v2024_v25, %v4498_v34  ;;  %v2484_v15 = vcombine.low %v1195_v26, %v1199_v14  ;;  %v2491_v10 = vrot.slane %v2481_v37, %v4498_v34  ;;  %v2498_v59 = vrot.slane %v2482_v39, %v4498_v34 }
 0x100   : > { %v2505_v27 = vrot.slane %v2483_v17, %v4498_v34  ;;  %v891_v57 = vrot.slane %v4621_v49, %v4480_v30  ;;  %v895_v28 = vrot.slane %v4621_v49, %v4483_v35  ;;  %v899_v43 = vrot.slane %v4621_v49, %v4486_v21 }
 0x101   : > { %v2039_v33 = vcombine.low %v2031_v11, %v2038_v38  ;;  %v2512_v46 = vrot.slane %v2484_v15, %v4498_v34  ;;  %v2513_v42 = vcombine.low %v2491_v10, %v2498_v59  ;;  %v903_v41 = vrot.slane %v4621_v49, %v4489_v29  ;;  %v546_v11 = vpop.xlane.xlu0 %545 }
 0x102   : > { %v907_v56 = vrot.slane %v4621_v49, %v4492_v36  ;;  %v911_v44 = vrot.slane %v4621_v49, %v4495_v0  ;;  %v2040_v47 = vcombine.low %v883_v52, %v887_v13  ;;  %v2041_v48 = vcombine.low %v891_v57, %v895_v28 }
 0x103   : > { %3238 = vperm.xlu1 %3831, %v2039_v33   ;;  %v2514_v32 = vcombine.low %v2505_v27, %v2512_v46  ;;  %v2521_v2 = vrot.slane %v2513_v42, %v4498_v34  ;;  %v2042_v12 = vcombine.low %v899_v43, %v903_v41  ;;  %v1235_v31 = vrot.slane %v555_v20, %v4474_v22  ;;  %v561_v33 = vpop.xlane.xlu1 %560 }
 0x104   : > { %v2043_v3 = vcombine.low %v907_v56, %v911_v44  ;;  %v2050_v58 = vrot.slane %v2040_v47, %v4498_v34  ;;  %v2057_v40 = vrot.slane %v2041_v48, %v4498_v34  ;;  %v1239_v4 = vrot.slane %v555_v20, %v4477_v1 }
 0x105   : > { %v2528_v9 = vrot.slane %v2514_v32, %v4498_v34  ;;  %v2064_v49 = vrot.slane %v2042_v12, %v4498_v34  ;;  %v1243_v53 = vrot.slane %v555_v20, %v4480_v30  ;;  %v1247_v5 = vrot.slane %v555_v20, %v4483_v35 }
 0x106   : > { %v2071_v8 = vrot.slane %v2043_v3, %v4498_v34  ;;  %v2072_v19 = vcombine.low %v2050_v58, %v2057_v40  ;;  %v1251_v24 = vrot.slane %v555_v20, %v4486_v21  ;;  %v1255_v26 = vrot.slane %v555_v20, %v4489_v29 }
 0x107   : > { %v2529_v25 = vcombine.low %v2521_v2, %v2528_v9  ;;  %v1259_v14 = vrot.slane %v555_v20, %v4492_v36  ;;  %v1263_v37 = vrot.slane %v555_v20, %v4495_v0  ;;  %v2579_v39 = vcombine.low %v1235_v31, %v1239_v4 }
 0x108   : > { %v2073_v17 = vcombine.low %v2064_v49, %v2071_v8  ;;  %v2080_v52 = vrot.slane %v2072_v19, %v4498_v34  ;;  %v2580_v13 = vcombine.low %v1243_v53, %v1247_v5  ;;  %v2581_v38 = vcombine.low %v1251_v24, %v1255_v26 }
 0x109   : > { %3268 = vperm.xlu0 %3830, %v2529_v25   ;;  %v2582_v15 = vcombine.low %v1259_v14, %v1263_v37  ;;  %v2589_v10 = vrot.slane %v2579_v39, %v4498_v34  ;;  %v1139_v59 = vrot.slane %v546_v11, %v4474_v22  ;;  %v1143_v27 = vrot.slane %v546_v11, %v4477_v1 }
 0x10a   : > { %v2087_v57 = vrot.slane %v2073_v17, %v4498_v34  ;;  %v2596_v28 = vrot.slane %v2580_v13, %v4498_v34  ;;  %v2603_v20 = vrot.slane %v2581_v38, %v4498_v34  ;;  %v1147_v43 = vrot.slane %v546_v11, %v4480_v30  ;;  %v552_v17 = vpop.xlane.xlu0 %551 }
 0x10b   : > { %v2610_v46 = vrot.slane %v2582_v15, %v4498_v34  ;;  %v1151_v42 = vrot.slane %v546_v11, %v4483_v35  ;;  %v1155_v41 = vrot.slane %v546_v11, %v4486_v21  ;;  %v1159_v56 = vrot.slane %v546_v11, %v4489_v29 }
 0x10c   : > { %v2088_v44 = vcombine.low %v2080_v52, %v2087_v57  ;;  %v2611_v47 = vcombine.low %v2589_v10, %v2596_v28  ;;  %v1163_v48 = vrot.slane %v546_v11, %v4492_v36  ;;  %v1167_v32 = vrot.slane %v546_v11, %v4495_v0 }
 0x10d   : > { %v2612_v2 = vcombine.low %v2603_v20, %v2610_v46  ;;  %v2432_v12 = vcombine.low %v1139_v59, %v1143_v27  ;;  %v2433_v31 = vcombine.low %v1147_v43, %v1151_v42  ;;  %v2434_v3 = vcombine.low %v1155_v41, %v1159_v56  ;;  %v567_v42 = vpop.xlane.xlu1 %566 }
 0x10e   : > { %3241 = vperm.xlu1 %3831, %v2088_v44   ;;  %v2619_v58 = vrot.slane %v2611_v47, %v4498_v34  ;;  %v2435_v40 = vcombine.low %v1163_v48, %v1167_v32  ;;  %v1299_v4 = vrot.slane %v561_v33, %v4474_v22  ;;  %v1303_v9 = vrot.slane %v561_v33, %v4477_v1 }
 0x10f   : > { %v2626_v49 = vrot.slane %v2612_v2, %v4498_v34  ;;  %v2442_v53 = vrot.slane %v2432_v12, %v4498_v34  ;;  %v2449_v5 = vrot.slane %v2433_v31, %v4498_v34  ;;  %v2456_v8 = vrot.slane %v2434_v3, %v4498_v34 }
 0x110   : > { %v2463_v19 = vrot.slane %v2435_v40, %v4498_v34  ;;  %v1307_v24 = vrot.slane %v561_v33, %v4480_v30  ;;  %v1311_v26 = vrot.slane %v561_v33, %v4483_v35  ;;  %v1315_v25 = vrot.slane %v561_v33, %v4486_v21 }
 0x111   : > { %v2627_v14 = vcombine.low %v2619_v58, %v2626_v49  ;;  %v2464_v37 = vcombine.low %v2442_v53, %v2449_v5  ;;  %v1319_v39 = vrot.slane %v561_v33, %v4489_v29  ;;  %v1323_v11 = vrot.slane %v561_v33, %v4492_v36 }
 0x112   : > { %v2465_v52 = vcombine.low %v2456_v8, %v2463_v19  ;;  %v1327_v13 = vrot.slane %v561_v33, %v4495_v0  ;;  %v2677_v38 = vcombine.low %v1299_v4, %v1303_v9  ;;  %v2678_v15 = vcombine.low %v1307_v24, %v1311_v26 }
 0x113   : > { %3274 = vperm.xlu0 %3830, %v2627_v14   ;;  %v2472_v10 = vrot.slane %v2464_v37, %v4498_v34  ;;  %v2679_v59 = vcombine.low %v1315_v25, %v1319_v39  ;;  %v1203_v27 = vrot.slane %v552_v17, %v4474_v22  ;;  %v1207_v57 = vrot.slane %v552_v17, %v4477_v1 }
 0x114   : > { %v2479_v28 = vrot.slane %v2465_v52, %v4498_v34  ;;  %v2680_v20 = vcombine.low %v1323_v11, %v1327_v13  ;;  %v2687_v43 = vrot.slane %v2677_v38, %v4498_v34  ;;  %v2694_v46 = vrot.slane %v2678_v15, %v4498_v34 }
 0x115   : > { %v2701_v33 = vrot.slane %v2679_v59, %v4498_v34  ;;  %v1211_v41 = vrot.slane %v552_v17, %v4480_v30  ;;  %v1215_v56 = vrot.slane %v552_v17, %v4483_v35  ;;  %v1219_v44 = vrot.slane %v552_v17, %v4486_v21 }
 0x116   : > { %v2480_v47 = vcombine.low %v2472_v10, %v2479_v28  ;;  %v2708_v48 = vrot.slane %v2680_v20, %v4498_v34  ;;  %v2709_v32 = vcombine.low %v2687_v43, %v2694_v46  ;;  %v1223_v2 = vrot.slane %v552_v17, %v4489_v29  ;;  %v558_v10 = vpop.xlane.xlu0 %557 }
 0x117   : > { %v1227_v12 = vrot.slane %v552_v17, %v4492_v36  ;;  %v1231_v31 = vrot.slane %v552_v17, %v4495_v0  ;;  %v2530_v3 = vcombine.low %v1203_v27, %v1207_v57  ;;  %v2531_v58 = vcombine.low %v1211_v41, %v1215_v56 }
 0x118   : > { %3265 = vperm.xlu1 %3831, %v2480_v47   ;;  %v2710_v40 = vcombine.low %v2701_v33, %v2708_v48  ;;  %v2717_v4 = vrot.slane %v2709_v32, %v4498_v34  ;;  %v2532_v9 = vcombine.low %v1219_v44, %v1223_v2  ;;  %v1363_v49 = vrot.slane %v567_v42, %v4474_v22  ;;  %v573_v47 = vpop.xlane.xlu1 %572 }
 0x119   : > { %v2533_v53 = vcombine.low %v1227_v12, %v1231_v31  ;;  %v2540_v5 = vrot.slane %v2530_v3, %v4498_v34  ;;  %v2547_v8 = vrot.slane %v2531_v58, %v4498_v34  ;;  %v1367_v19 = vrot.slane %v567_v42, %v4477_v1 }
 0x11a   : > { %v2724_v24 = vrot.slane %v2710_v40, %v4498_v34  ;;  %v2554_v26 = vrot.slane %v2532_v9, %v4498_v34  ;;  %v1371_v25 = vrot.slane %v567_v42, %v4480_v30  ;;  %v1375_v14 = vrot.slane %v567_v42, %v4483_v35 }
 0x11b   : > { %v2561_v37 = vrot.slane %v2533_v53, %v4498_v34  ;;  %v2562_v39 = vcombine.low %v2540_v5, %v2547_v8  ;;  %v1379_v11 = vrot.slane %v567_v42, %v4486_v21  ;;  %v1383_v17 = vrot.slane %v567_v42, %v4489_v29 }
 0x11c   : > { %v2725_v52 = vcombine.low %v2717_v4, %v2724_v24  ;;  %v1387_v13 = vrot.slane %v567_v42, %v4492_v36  ;;  %v1391_v38 = vrot.slane %v567_v42, %v4495_v0  ;;  %v2775_v15 = vcombine.low %v1363_v49, %v1367_v19 }
 0x11d   : > { %v2563_v59 = vcombine.low %v2554_v26, %v2561_v37  ;;  %v2570_v27 = vrot.slane %v2562_v39, %v4498_v34  ;;  %v2776_v57 = vcombine.low %v1371_v25, %v1375_v14  ;;  %v2777_v28 = vcombine.low %v1379_v11, %v1383_v17  ;;  %v564_v26 = vpop.xlane.xlu0 %563 }
 0x11e   : > { %3280 = vperm.xlu0 %3830, %v2725_v52   ;;  %v2778_v20 = vcombine.low %v1387_v13, %v1391_v38  ;;  %v2785_v43 = vrot.slane %v2775_v15, %v4498_v34  ;;  %v1267_v46 = vrot.slane %v558_v10, %v4474_v22  ;;  %v1271_v33 = vrot.slane %v558_v10, %v4477_v1 }
 0x11f   : > { %v2577_v41 = vrot.slane %v2563_v59, %v4498_v34  ;;  %v2792_v56 = vrot.slane %v2776_v57, %v4498_v34  ;;  %v2799_v42 = vrot.slane %v2777_v28, %v4498_v34  ;;  %v1275_v44 = vrot.slane %v558_v10, %v4480_v30 }
 0x120   : > { %v2806_v48 = vrot.slane %v2778_v20, %v4498_v34  ;;  %v1279_v32 = vrot.slane %v558_v10, %v4483_v35  ;;  %v1283_v2 = vrot.slane %v558_v10, %v4486_v21  ;;  %v1287_v12 = vrot.slane %v558_v10, %v4489_v29 }
 0x121   : > { %v2578_v31 = vcombine.low %v2570_v27, %v2577_v41  ;;  %v2807_v3 = vcombine.low %v2785_v43, %v2792_v56  ;;  %v1291_v58 = vrot.slane %v558_v10, %v4492_v36  ;;  %v1295_v40 = vrot.slane %v558_v10, %v4495_v0 }
 0x122   : > { %v2808_v4 = vcombine.low %v2799_v42, %v2806_v48  ;;  %v2628_v9 = vcombine.low %v1267_v46, %v1271_v33  ;;  %v2629_v49 = vcombine.low %v1275_v44, %v1279_v32  ;;  %v2630_v53 = vcombine.low %v1283_v2, %v1287_v12  ;;  %v570_v32 = vpop.xlane.xlu0 %569 }
 0x123   : > { %3271 = vperm.xlu1 %3831, %v2578_v31   ;;  %v2815_v5 = vrot.slane %v2807_v3, %v4498_v34  ;;  %v2631_v8 = vcombine.low %v1291_v58, %v1295_v40  ;;  %v1427_v19 = vrot.slane %v573_v47, %v4474_v22  ;;  %v1431_v24 = vrot.slane %v573_v47, %v4477_v1 }
 0x124   : > { %v2822_v25 = vrot.slane %v2808_v4, %v4498_v34  ;;  %v2638_v14 = vrot.slane %v2628_v9, %v4498_v34  ;;  %v2645_v37 = vrot.slane %v2629_v49, %v4498_v34  ;;  %v2652_v39 = vrot.slane %v2630_v53, %v4498_v34 }
 0x125   : > { %v2659_v11 = vrot.slane %v2631_v8, %v4498_v34  ;;  %v1435_v17 = vrot.slane %v573_v47, %v4480_v30  ;;  %v1439_v52 = vrot.slane %v573_v47, %v4483_v35  ;;  %v1443_v13 = vrot.slane %v573_v47, %v4486_v21 }
 0x126   : > { %v2823_v38 = vcombine.low %v2815_v5, %v2822_v25  ;;  %v2660_v15 = vcombine.low %v2638_v14, %v2645_v37  ;;  %v1447_v10 = vrot.slane %v573_v47, %v4489_v29  ;;  %v1451_v59 = vrot.slane %v573_v47, %v4492_v36 }
 0x127   : > { %v2661_v27 = vcombine.low %v2652_v39, %v2659_v11  ;;  %v1455_v57 = vrot.slane %v573_v47, %v4495_v0  ;;  %v2873_v28 = vcombine.low %v1427_v19, %v1431_v24  ;;  %v2874_v20 = vcombine.low %v1435_v17, %v1439_v52 }
 0x128   : > { %3286 = vperm.xlu0 %3830, %v2823_v38   ;;  %v2668_v43 = vrot.slane %v2660_v15, %v4498_v34  ;;  %v2875_v46 = vcombine.low %v1443_v13, %v1447_v10  ;;  %v1331_v33 = vrot.slane %v564_v26, %v4474_v22  ;;  %v1335_v41 = vrot.slane %v564_v26, %v4477_v1  ;;  %v576_v38 = vpop.xlane.xlu0 %575 }
 0x129   : > { %v2675_v56 = vrot.slane %v2661_v27, %v4498_v34  ;;  %v2876_v42 = vcombine.low %v1451_v59, %v1455_v57  ;;  %v2883_v44 = vrot.slane %v2873_v28, %v4498_v34  ;;  %v2890_v48 = vrot.slane %v2874_v20, %v4498_v34 }
 0x12a   : > { %v2897_v47 = vrot.slane %v2875_v46, %v4498_v34  ;;  %v1339_v2 = vrot.slane %v564_v26, %v4480_v30  ;;  %v1343_v12 = vrot.slane %v564_v26, %v4483_v35  ;;  %v1347_v31 = vrot.slane %v564_v26, %v4486_v21 }
 0x12b   : > { %v2676_v3 = vcombine.low %v2668_v43, %v2675_v56  ;;  %v2904_v58 = vrot.slane %v2876_v42, %v4498_v34  ;;  %v2905_v40 = vcombine.low %v2883_v44, %v2890_v48  ;;  %v1351_v4 = vrot.slane %v564_v26, %v4489_v29 }
 0x12c   : > { %v1355_v9 = vrot.slane %v564_v26, %v4492_v36  ;;  %v1359_v49 = vrot.slane %v564_v26, %v4495_v0  ;;  %v2726_v53 = vcombine.low %v1331_v33, %v1335_v41  ;;  %v2727_v5 = vcombine.low %v1339_v2, %v1343_v12 }
 0x12d   : > { %3277 = vperm.xlu1 %3831, %v2676_v3   ;;  %v2906_v8 = vcombine.low %v2897_v47, %v2904_v58  ;;  %v2913_v19 = vrot.slane %v2905_v40, %v4498_v34  ;;  %v2728_v24 = vcombine.low %v1347_v31, %v1351_v4  ;;  %v1395_v25 = vrot.slane %v570_v32, %v4474_v22 }
 0x12e   : > { %v2729_v14 = vcombine.low %v1355_v9, %v1359_v49  ;;  %v2736_v37 = vrot.slane %v2726_v53, %v4498_v34  ;;  %v2743_v39 = vrot.slane %v2727_v5, %v4498_v34  ;;  %v1399_v11 = vrot.slane %v570_v32, %v4477_v1 }
 0x12f   : > { %v2920_v17 = vrot.slane %v2906_v8, %v4498_v34  ;;  %v2750_v26 = vrot.slane %v2728_v24, %v4498_v34  ;;  %v1403_v52 = vrot.slane %v570_v32, %v4480_v30  ;;  %v1407_v13 = vrot.slane %v570_v32, %v4483_v35 }
 0x130   : > { %v2757_v15 = vrot.slane %v2729_v14, %v4498_v34  ;;  %v2758_v10 = vcombine.low %v2736_v37, %v2743_v39  ;;  %v1411_v59 = vrot.slane %v570_v32, %v4486_v21  ;;  %v1415_v27 = vrot.slane %v570_v32, %v4489_v29 }
 0x131   : > { %v2921_v57 = vcombine.low %v2913_v19, %v2920_v17  ;;  %v1419_v28 = vrot.slane %v570_v32, %v4492_v36  ;;  %v1423_v20 = vrot.slane %v570_v32, %v4495_v0  ;;  %v2824_v43 = vcombine.low %v1395_v25, %v1399_v11 }
 0x132   : > { %v2759_v46 = vcombine.low %v2750_v26, %v2757_v15  ;;  %v2766_v33 = vrot.slane %v2758_v10, %v4498_v34  ;;  %v2825_v41 = vcombine.low %v1403_v52, %v1407_v13  ;;  %v2826_v56 = vcombine.low %v1411_v59, %v1415_v27 }
 0x133   : > { %3292 = vperm.xlu0 %3830, %v2921_v57   ;;  %v2827_v42 = vcombine.low %v1419_v28, %v1423_v20  ;;  %v2834_v44 = vrot.slane %v2824_v43, %v4498_v34  ;;  %v1459_v48 = vrot.slane %v576_v38, %v4474_v22  ;;  %v1463_v47 = vrot.slane %v576_v38, %v4477_v1 }
 0x134   : > { %v2773_v2 = vrot.slane %v2759_v46, %v4498_v34  ;;  %v2841_v12 = vrot.slane %v2825_v41, %v4498_v34  ;;  %v2848_v32 = vrot.slane %v2826_v56, %v4498_v34  ;;  %v1467_v31 = vrot.slane %v576_v38, %v4480_v30 }
 0x135   : > { %v2855_v3 = vrot.slane %v2827_v42, %v4498_v34  ;;  %v1471_v58 = vrot.slane %v576_v38, %v4483_v35  ;;  %v1475_v40 = vrot.slane %v576_v38, %v4486_v21  ;;  %v1479_v4 = vrot.slane %v576_v38, %v4489_v29 }
 0x136   : > { %v2774_v9 = vcombine.low %v2766_v33, %v2773_v2  ;;  %v2856_v49 = vcombine.low %v2834_v44, %v2841_v12  ;;  %v1483_v53 = vrot.slane %v576_v38, %v4492_v36  ;;  %v1487_v5 = vrot.slane %v576_v38, %v4495_v0  ;;  %v579_v38 = vpop.xlane.xlu1 %578 }
 0x137   : > { %v2857_v8 = vcombine.low %v2848_v32, %v2855_v3  ;;  %v2922_v19 = vcombine.low %v1459_v48, %v1463_v47  ;;  %v2923_v24 = vcombine.low %v1467_v31, %v1471_v58  ;;  %v2924_v25 = vcombine.low %v1475_v40, %v1479_v4 }
 0x138   : > { %3283 = vperm.xlu1 %3831, %v2774_v9   ;;  %v2864_v14 = vrot.slane %v2856_v49, %v4498_v34  ;;  %v2925_v37 = vcombine.low %v1483_v53, %v1487_v5  ;;  %v947_v39 = vrot.slane %v4645_v18, %v4474_v22  ;;  %v951_v11 = vrot.slane %v4645_v18, %v4477_v1 }
 0x139   : > { %v2871_v17 = vrot.slane %v2857_v8, %v4498_v34  ;;  %v2932_v26 = vrot.slane %v2922_v19, %v4498_v34  ;;  %v2939_v52 = vrot.slane %v2923_v24, %v4498_v34  ;;  %v2946_v13 = vrot.slane %v2924_v25, %v4498_v34 }
 0x13a   : > { %v2953_v15 = vrot.slane %v2925_v37, %v4498_v34  ;;  %v955_v10 = vrot.slane %v4645_v18, %v4480_v30  ;;  %v959_v59 = vrot.slane %v4645_v18, %v4483_v35  ;;  %v963_v27 = vrot.slane %v4645_v18, %v4486_v21 }
 0x13b   : > { %v2872_v57 = vcombine.low %v2864_v14, %v2871_v17  ;;  %v2954_v28 = vcombine.low %v2932_v26, %v2939_v52  ;;  %v967_v20 = vrot.slane %v4645_v18, %v4489_v29  ;;  %v971_v43 = vrot.slane %v4645_v18, %v4492_v36 }
 0x13c   : > { %v2955_v46 = vcombine.low %v2946_v13, %v2953_v15  ;;  %v975_v33 = vrot.slane %v4645_v18, %v4495_v0  ;;  %v2138_v41 = vcombine.low %v947_v39, %v951_v11  ;;  %v2139_v56 = vcombine.low %v955_v10, %v959_v59  ;;  %v582_v59 = vpop.xlane.xlu0 %581 }
 0x13d   : > { %3289 = vperm.xlu1 %3831, %v2872_v57   ;;  %v2962_v42 = vrot.slane %v2954_v28, %v4498_v34  ;;  %v2140_v44 = vcombine.low %v963_v27, %v967_v20  ;;  %v1491_v48 = vrot.slane %v579_v38, %v4474_v22  ;;  %v1495_v47 = vrot.slane %v579_v38, %v4477_v1 }
 0x13e   : > { %v2969_v2 = vrot.slane %v2955_v46, %v4498_v34  ;;  %v2141_v12 = vcombine.low %v971_v43, %v975_v33  ;;  %v2148_v32 = vrot.slane %v2138_v41, %v4498_v34  ;;  %v2155_v31 = vrot.slane %v2139_v56, %v4498_v34 }
 0x13f   : > { %v2162_v3 = vrot.slane %v2140_v44, %v4498_v34  ;;  %v1499_v18 = vrot.slane %v579_v38, %v4480_v30  ;;  %v1503_v58 = vrot.slane %v579_v38, %v4483_v35  ;;  %v1507_v40 = vrot.slane %v579_v38, %v4486_v21 }
 0x140   : > { %v2970_v4 = vcombine.low %v2962_v42, %v2969_v2  ;;  %v2169_v9 = vrot.slane %v2141_v12, %v4498_v34  ;;  %v2170_v49 = vcombine.low %v2148_v32, %v2155_v31  ;;  %v1511_v53 = vrot.slane %v579_v38, %v4489_v29 }
 0x141   : > { %v1515_v5 = vrot.slane %v579_v38, %v4492_v36  ;;  %v1519_v8 = vrot.slane %v579_v38, %v4495_v0  ;;  %v2971_v19 = vcombine.low %v1491_v48, %v1495_v47  ;;  %v2972_v24 = vcombine.low %v1499_v18, %v1503_v58 }
 0x142   : > { %3295 = vperm.xlu0 %3830, %v2970_v4   ;;  %v2171_v25 = vcombine.low %v2162_v3, %v2169_v9  ;;  %v2178_v14 = vrot.slane %v2170_v49, %v4498_v34  ;;  %v2973_v37 = vcombine.low %v1507_v40, %v1511_v53  ;;  %v979_v39 = vrot.slane %v4577_v62, %v4474_v22 }
 0x143   : > { %v2974_v11 = vcombine.low %v1515_v5, %v1519_v8  ;;  %v2981_v17 = vrot.slane %v2971_v19, %v4498_v34  ;;  %v2988_v26 = vrot.slane %v2972_v24, %v4498_v34  ;;  %v983_v52 = vrot.slane %v4577_v62, %v4477_v1 }
 0x144   : > { %v2185_v13 = vrot.slane %v2171_v25, %v4498_v34  ;;  %v2995_v38 = vrot.slane %v2973_v37, %v4498_v34  ;;  %v987_v15 = vrot.slane %v4577_v62, %v4480_v30  ;;  %v991_v10 = vrot.slane %v4577_v62, %v4483_v35 }
 0x145   : > { %v3002_v27 = vrot.slane %v2974_v11, %v4498_v34  ;;  %v3003_v57 = vcombine.low %v2981_v17, %v2988_v26  ;;  %v995_v28 = vrot.slane %v4577_v62, %v4486_v21  ;;  %v999_v20 = vrot.slane %v4577_v62, %v4489_v29 }
 0x146   : > { %v2186_v43 = vcombine.low %v2178_v14, %v2185_v13  ;;  %v1003_v46 = vrot.slane %v4577_v62, %v4492_v36  ;;  %v1007_v33 = vrot.slane %v4577_v62, %v4495_v0  ;;  %v2187_v41 = vcombine.low %v979_v39, %v983_v52 }
 0x147   : > { %v3004_v56 = vcombine.low %v2995_v38, %v3002_v27  ;;  %v3011_v42 = vrot.slane %v3003_v57, %v4498_v34  ;;  %v2188_v44 = vcombine.low %v987_v15, %v991_v10  ;;  %v2189_v48 = vcombine.low %v995_v28, %v999_v20  ;;  %v585_v15 = vpop.xlane.xlu1 %584 }
 0x148   : > { %3247 = vperm.xlu1 %3831, %v2186_v43   ;;  %v2190_v47 = vcombine.low %v1003_v46, %v1007_v33  ;;  %v2197_v2 = vrot.slane %v2187_v41, %v4498_v34  ;;  %v1523_v12 = vrot.slane %v582_v59, %v4474_v22  ;;  %v1527_v32 = vrot.slane %v582_v59, %v4477_v1 }
 0x149   : > { %v3018_v31 = vrot.slane %v3004_v56, %v4498_v34  ;;  %v2204_v3 = vrot.slane %v2188_v44, %v4498_v34  ;;  %v2211_v62 = vrot.slane %v2189_v48, %v4498_v34  ;;  %v1531_v18 = vrot.slane %v582_v59, %v4480_v30 }
 0x14a   : > { %v2218_v58 = vrot.slane %v2190_v47, %v4498_v34  ;;  %v1535_v40 = vrot.slane %v582_v59, %v4483_v35  ;;  %v1539_v4 = vrot.slane %v582_v59, %v4486_v21  ;;  %v1543_v9 = vrot.slane %v582_v59, %v4489_v29 }
 0x14b   : > { %v3019_v49 = vcombine.low %v3011_v42, %v3018_v31  ;;  %v2219_v53 = vcombine.low %v2197_v2, %v2204_v3  ;;  %v1547_v5 = vrot.slane %v582_v59, %v4492_v36  ;;  %v1551_v8 = vrot.slane %v582_v59, %v4495_v0 }
 0x14c   : > { %v2220_v19 = vcombine.low %v2211_v62, %v2218_v58  ;;  %v3020_v24 = vcombine.low %v1523_v12, %v1527_v32  ;;  %v3021_v25 = vcombine.low %v1531_v18, %v1535_v40  ;;  %v3022_v14 = vcombine.low %v1539_v4, %v1543_v9 }
 0x14d   : > { %3298 = vperm.xlu0 %3830, %v3019_v49   ;;  %v2227_v37 = vrot.slane %v2219_v53, %v4498_v34  ;;  %v3023_v39 = vcombine.low %v1547_v5, %v1551_v8  ;;  %v1011_v11 = vrot.slane %v4669_v6, %v4474_v22  ;;  %v1015_v17 = vrot.slane %v4669_v6, %v4477_v1 }
 0x14e   : > { %v2234_v26 = vrot.slane %v2220_v19, %v4498_v34  ;;  %v3030_v52 = vrot.slane %v3020_v24, %v4498_v34  ;;  %v3037_v13 = vrot.slane %v3021_v25, %v4498_v34  ;;  %v3044_v38 = vrot.slane %v3022_v14, %v4498_v34 }
 0x14f   : > { %v3051_v10 = vrot.slane %v3023_v39, %v4498_v34  ;;  %v1019_v59 = vrot.slane %v4669_v6, %v4480_v30  ;;  %v1023_v27 = vrot.slane %v4669_v6, %v4483_v35  ;;  %v1027_v57 = vrot.slane %v4669_v6, %v4486_v21 }
 0x150   : > { %v2235_v28 = vcombine.low %v2227_v37, %v2234_v26  ;;  %v3052_v20 = vcombine.low %v3030_v52, %v3037_v13  ;;  %v1031_v43 = vrot.slane %v4669_v6, %v4489_v29  ;;  %v1035_v46 = vrot.slane %v4669_v6, %v4492_v36 }
 0x151   : > { %v3053_v33 = vcombine.low %v3044_v38, %v3051_v10  ;;  %v1039_v41 = vrot.slane %v4669_v6, %v4495_v0  ;;  %v2236_v56 = vcombine.low %v1011_v11, %v1015_v17  ;;  %v2237_v42 = vcombine.low %v1019_v59, %v1023_v27  ;;  %v588_v10 = vpop.xlane.xlu0 %587 }
 0x152   : > { %3250 = vperm.xlu1 %3831, %v2235_v28   ;;  %v3060_v44 = vrot.slane %v3052_v20, %v4498_v34  ;;  %v2238_v48 = vcombine.low %v1027_v57, %v1031_v43  ;;  %v1555_v47 = vrot.slane %v585_v15, %v4474_v22  ;;  %v1559_v2 = vrot.slane %v585_v15, %v4477_v1 }
 0x153   : > { %v3067_v12 = vrot.slane %v3053_v33, %v4498_v34  ;;  %v2239_v32 = vcombine.low %v1035_v46, %v1039_v41  ;;  %v2246_v31 = vrot.slane %v2236_v56, %v4498_v34  ;;  %v2253_v3 = vrot.slane %v2237_v42, %v4498_v34 }
 0x154   : > { %v2260_v62 = vrot.slane %v2238_v48, %v4498_v34  ;;  %v1563_v6 = vrot.slane %v585_v15, %v4480_v30  ;;  %v1567_v18 = vrot.slane %v585_v15, %v4483_v35  ;;  %v1571_v58 = vrot.slane %v585_v15, %v4486_v21 }
 0x155   : > { %v3068_v40 = vcombine.low %v3060_v44, %v3067_v12  ;;  %v2267_v4 = vrot.slane %v2239_v32, %v4498_v34  ;;  %v2268_v9 = vcombine.low %v2246_v31, %v2253_v3  ;;  %v1575_v49 = vrot.slane %v585_v15, %v4489_v29 }
 0x156   : > { %v1579_v53 = vrot.slane %v585_v15, %v4492_v36  ;;  %v1583_v5 = vrot.slane %v585_v15, %v4495_v0  ;;  %v3069_v8 = vcombine.low %v1555_v47, %v1559_v2  ;;  %v3070_v19 = vcombine.low %v1563_v6, %v1567_v18 }
 0x157   : > { %3301 = vperm.xlu0 %3830, %v3068_v40   ;;  %v2269_v24 = vcombine.low %v2260_v62, %v2267_v4  ;;  %v2276_v25 = vrot.slane %v2268_v9, %v4498_v34  ;;  %v3071_v14 = vcombine.low %v1571_v58, %v1575_v49  ;;  %v1043_v37 = vrot.slane %v4597_v16, %v4474_v22 }
 0x158   : > { %v3072_v39 = vcombine.low %v1579_v53, %v1583_v5  ;;  %v3079_v11 = vrot.slane %v3069_v8, %v4498_v34  ;;  %v3086_v17 = vrot.slane %v3070_v19, %v4498_v34  ;;  %v1047_v26 = vrot.slane %v4597_v16, %v4477_v1 }
 0x159   : > { %v2283_v52 = vrot.slane %v2269_v24, %v4498_v34  ;;  %v3093_v13 = vrot.slane %v3071_v14, %v4498_v34  ;;  %v1051_v38 = vrot.slane %v4597_v16, %v4480_v30  ;;  %v1055_v15 = vrot.slane %v4597_v16, %v4483_v35 }
 0x15a   : > { %v3100_v59 = vrot.slane %v3072_v39, %v4498_v34  ;;  %v3101_v27 = vcombine.low %v3079_v11, %v3086_v17  ;;  %v1059_v57 = vrot.slane %v4597_v16, %v4486_v21  ;;  %v1063_v28 = vrot.slane %v4597_v16, %v4489_v29 }
 0x15b   : > { %v2284_v20 = vcombine.low %v2276_v25, %v2283_v52  ;;  %v1067_v43 = vrot.slane %v4597_v16, %v4492_v36  ;;  %v1071_v46 = vrot.slane %v4597_v16, %v4495_v0  ;;  %v2285_v33 = vcombine.low %v1043_v37, %v1047_v26  ;;  %v591_v52 = vpop.xlane.xlu1 %590 }
 0x15c   : > { %v3102_v41 = vcombine.low %v3093_v13, %v3100_v59  ;;  %v3109_v56 = vrot.slane %v3101_v27, %v4498_v34  ;;  %v2286_v42 = vcombine.low %v1051_v38, %v1055_v15  ;;  %v2287_v44 = vcombine.low %v1059_v57, %v1063_v28 }
 0x15d   : > { %3253 = vperm.xlu1 %3831, %v2284_v20   ;;  %v2288_v48 = vcombine.low %v1067_v43, %v1071_v46  ;;  %v2295_v47 = vrot.slane %v2285_v33, %v4498_v34  ;;  %v1587_v2 = vrot.slane %v588_v10, %v4474_v22  ;;  %v1591_v12 = vrot.slane %v588_v10, %v4477_v1 }
 0x15e   : > { %v3116_v32 = vrot.slane %v3102_v41, %v4498_v34  ;;  %v2302_v31 = vrot.slane %v2286_v42, %v4498_v34  ;;  %v2309_v16 = vrot.slane %v2287_v44, %v4498_v34  ;;  %v1595_v3 = vrot.slane %v588_v10, %v4480_v30 }
 0x15f   : > { %v2316_v62 = vrot.slane %v2288_v48, %v4498_v34  ;;  %v1599_v6 = vrot.slane %v588_v10, %v4483_v35  ;;  %v1603_v18 = vrot.slane %v588_v10, %v4486_v21  ;;  %v1607_v58 = vrot.slane %v588_v10, %v4489_v29 }
 0x160   : > { %v3117_v40 = vcombine.low %v3109_v56, %v3116_v32  ;;  %v2317_v4 = vcombine.low %v2295_v47, %v2302_v31  ;;  %v1611_v9 = vrot.slane %v588_v10, %v4492_v36  ;;  %v1615_v49 = vrot.slane %v588_v10, %v4495_v0  ;;  %v5074_v63 = vpop.permute.xlu1 %3220 }
 0x161   : > { %v2318_v53 = vcombine.low %v2309_v16, %v2316_v62  ;;  %v3118_v5 = vcombine.low %v1587_v2, %v1591_v12  ;;  %v3119_v8 = vcombine.low %v1595_v3, %v1599_v6  ;;  %v3120_v19 = vcombine.low %v1603_v18, %v1607_v58 }
 0x162   : > { %3304 = vperm.xlu0 %3830, %v3117_v40   ;;  %v2325_v24 = vrot.slane %v2317_v4, %v4498_v34  ;;  %v3121_v25 = vcombine.low %v1611_v9, %v1615_v49  ;;  %v1075_v14 = vrot.slane %v4692_v45, %v4474_v22  ;;  %v1079_v37 = vrot.slane %v4692_v45, %v4477_v1 }
 0x163   : > { %v2332_v39 = vrot.slane %v2318_v53, %v4498_v34  ;;  %v3128_v11 = vrot.slane %v3118_v5, %v4498_v34  ;;  %v3135_v17 = vrot.slane %v3119_v8, %v4498_v34  ;;  %v3142_v26 = vrot.slane %v3120_v19, %v4498_v34 }
 0x164   : > { %v3149_v13 = vrot.slane %v3121_v25, %v4498_v34  ;;  %v1083_v38 = vrot.slane %v4692_v45, %v4480_v30  ;;  %v1087_v15 = vrot.slane %v4692_v45, %v4483_v35  ;;  %v1091_v10 = vrot.slane %v4692_v45, %v4486_v21 }
 0x165   : > { %v2333_v59 = vcombine.low %v2325_v24, %v2332_v39  ;;  %v3150_v27 = vcombine.low %v3128_v11, %v3135_v17  ;;  %v1095_v57 = vrot.slane %v4692_v45, %v4489_v29  ;;  %v1099_v28 = vrot.slane %v4692_v45, %v4492_v36 }
 0x166   : > { %v3151_v20 = vcombine.low %v3142_v26, %v3149_v13  ;;  %v1103_v43 = vrot.slane %v4692_v45, %v4495_v0  ;;  %v2334_v46 = vcombine.low %v1075_v14, %v1079_v37  ;;  %v2335_v33 = vcombine.low %v1083_v38, %v1087_v15 }
 0x167   : > { %3256 = vperm.xlu1 %3831, %v2333_v59   ;;  %v3158_v41 = vrot.slane %v3150_v27, %v4498_v34  ;;  %v2336_v56 = vcombine.low %v1091_v10, %v1095_v57  ;;  %v1619_v42 = vrot.slane %v591_v52, %v4474_v22  ;;  %v1623_v44 = vrot.slane %v591_v52, %v4477_v1 }
 0x168   : > { %v3165_v48 = vrot.slane %v3151_v20, %v4498_v34  ;;  %v2337_v47 = vcombine.low %v1099_v28, %v1103_v43  ;;  %v2344_v2 = vrot.slane %v2334_v46, %v4498_v34  ;;  %v2351_v12 = vrot.slane %v2335_v33, %v4498_v34 }
 0x169   : > { %v2358_v32 = vrot.slane %v2336_v56, %v4498_v34  ;;  %v1627_v45 = vrot.slane %v591_v52, %v4480_v30  ;;  %v1631_v31 = vrot.slane %v591_v52, %v4483_v35  ;;  %v1635_v16 = vrot.slane %v591_v52, %v4486_v21 }
 0x16a   : > { %v3166_v3 = vcombine.low %v3158_v41, %v3165_v48  ;;  %v2365_v62 = vrot.slane %v2337_v47, %v4498_v34  ;;  %v2366_v6 = vcombine.low %v2344_v2, %v2351_v12  ;;  %v1639_v18 = vrot.slane %v591_v52, %v4489_v29 }
 0x16b   : > { %v1643_v58 = vrot.slane %v591_v52, %v4492_v36  ;;  %v1647_v40 = vrot.slane %v591_v52, %v4495_v0  ;;  %v3167_v4 = vcombine.low %v1619_v42, %v1623_v44  ;;  %v3168_v9 = vcombine.low %v1627_v45, %v1631_v31 }
 0x16c   : > { %3307 = vperm.xlu0 %3830, %v3166_v3   ;;  %v2367_v49 = vcombine.low %v2358_v32, %v2365_v62  ;;  %v2374_v53 = vrot.slane %v2366_v6, %v4498_v34  ;;  %v3169_v5 = vcombine.low %v1635_v16, %v1639_v18  ;;  %v1107_v8 = vrot.slane %v4623_v54, %v4474_v22 }
 0x16d   : > { %v3170_v19 = vcombine.low %v1643_v58, %v1647_v40  ;;  %v3177_v24 = vrot.slane %v3167_v4, %v4498_v34  ;;  %v3184_v25 = vrot.slane %v3168_v9, %v4498_v34  ;;  %v1111_v14 = vrot.slane %v4623_v54, %v4477_v1 }
 0x16e   : > { %v2381_v37 = vrot.slane %v2367_v49, %v4498_v34  ;;  %v3191_v39 = vrot.slane %v3169_v5, %v4498_v34  ;;  %v1115_v11 = vrot.slane %v4623_v54, %v4480_v30  ;;  %v1119_v17 = vrot.slane %v4623_v54, %v4483_v35 }
 0x16f   : > { %v3198_v22 = vrot.slane %v3170_v19, %v4498_v34  ;;  %v3199_v26 = vcombine.low %v3177_v24, %v3184_v25  ;;  %v1123_v52 = vrot.slane %v4623_v54, %v4486_v21  ;;  %v1127_v13 = vrot.slane %v4623_v54, %v4489_v29 }
 0x170   : > { %v2382_v1 = vcombine.low %v2374_v53, %v2381_v37  ;;  %v1131_v38 = vrot.slane %v4623_v54, %v4492_v36  ;;  %v1135_v15 = vrot.slane %v4623_v54, %v4495_v0  ;;  %v2383_v30 = vcombine.low %v1107_v8, %v1111_v14 }
 0x171   : > { %v3200_v10 = vcombine.low %v3191_v39, %v3198_v22  ;;  %v3207_v35 = vrot.slane %v3199_v26, %v4498_v34  ;;  %v2384_v59 = vcombine.low %v1115_v11, %v1119_v17  ;;  %v2385_v27 = vcombine.low %v1123_v52, %v1127_v13 }
 0x172   : > { %3259 = vperm.xlu1 %3831, %v2382_v1   ;;  %v2386_v57 = vcombine.low %v1131_v38, %v1135_v15  ;;  %v2393_v21 = vrot.slane %v2383_v30, %v4498_v34  ;;  %v485_v42 = vrot.slane %v478_v55, %v4498_v34  ;;  %v4011_v44 = vmov 0.0  }
 0x173   : > { %v3214_v29 = vrot.slane %v3200_v10, %v4498_v34  ;;  %v2400_v28 = vrot.slane %v2384_v59, %v4498_v34  ;;  %v2407_v36 = vrot.slane %v2385_v27, %v4498_v34  ;;  %237 = vst.msk [vmem:[#allocation2] sm:$0x3] %vm5052_vm0, %v4011_v44  ;;  %v460_v48 = vrot.slane %v453_v61, %v4498_v34 }
 0x174   : > { %v2414_v20 = vrot.slane %v2386_v57, %v4498_v34  ;;  %v4012_v47 = vmov -inf   ;;  %v492_v2 = vrot.slane %v485_v42, %v4498_v34 }
 0x175   : > { %v3215_v0 = vcombine.low %v3207_v35, %v3214_v29  ;;  %v2415_v54 = vcombine.low %v2393_v21, %v2400_v28  ;;  %236 = vst.msk [vmem:[%s211_s6] sm:$0x3] %vm5052_vm0, %v4012_v47  ;;  %v467_v50 = vrot.slane %v460_v48, %v4498_v34 }
 0x176   : > { %v2416_v43 = vcombine.low %v2407_v36, %v2414_v20 }
 0x177   : > { %3310 = vperm.xlu0 %3830, %v3215_v0   ;;  %v2423_v46 = vrot.slane %v2415_v54, %v4498_v34 }
 0x178   : > { %v2430_v33 = vrot.slane %v2416_v43, %v4498_v34 }
 0x17a   : > { %v2431_v41 = vcombine.low %v2423_v46, %v2430_v33  ;;  %v475_v60 = vld [vmem:[#allocation2] sm:$0x3] }
 0x17b   : > { %v494_v55 = vadd.f32 %v492_v2, %v475_v60 }
 0x17c   : > { %3262 = vperm.xlu1 %3831, %v2431_v41   ;;  %v450_v51 = vld [vmem:[%s211_s6] sm:$0x3] }
 0x17d   : > { %495 = vst.msk [vmem:[#allocation2] sm:$0x3] %vm5052_vm0, %v494_v55  ;;  %v469_v61 = vmax.f32 %v450_v51, %v467_v50 }
 0x17f   : > { %474 = vst.msk [vmem:[%s211_s6] sm:$0x3] %vm5052_vm0, %v469_v61 }
 0x180   : > { %3875 = shalt.err (!%p3872_p5)
}
 0x181   : > { %s3876_s23 = scalar_lea.hbm %s5082_s4, 32  ;;  %s3880_s6 = scalar_lea.hbm %s5313_s1, 64 }
 0x182   : > { %p3877_p4 = scmp.ne.s32.totalorder %s5082_s4, %s3876_s23  ;;  %p3881_p12 = scmp.lt.u32.totalorder %s5082_s4, %s5313_s1 }
 0x183   : > { %p3882_p1 = scmp.lt.u32.totalorder %s3880_s6, %s3876_s23  ;;  %p3884_p8 = scmp.lt.u32.totalorder %s3876_s23, %s5082_s4 }
 0x184   : > { %p3878_p7 = pnand %p3877_p4, %p5325_p9 }
 0x185   : > { %p3883_p3 = por %p3882_p1, %p3881_p12 }
 0x186   : > { %p3879_p10 = pneg %p3878_p7 }
 0x187   : > { %p3885_p11 = por %p3884_p8, %p3883_p3 }
 0x189   : > { %p3886_p0 = pnand %p3885_p11, %p3879_p10 }
 0x18b   : > { %3889 = shalt.err (!%p3886_p0)
}
 0x18c   : > { %3754 = dma.vmem_to_hbm [thread:$0]  (%p5325_p9), %s5084_s9, 32, %s5082_s4, %s3526_s5   ;;  %v5112_v12 = vpop.permute.xlu1 %3223  ;;  %v3522_v32 = vld [vmem:[#allocation2] sm:$0x3] }
 0x18d   : > { %s218_s7 = scalar_lea.vmem [#allocation7], %s5049_s24  ;;  %v3523_v45 = vmul.f32 0.00390625, %v3522_v32  ;;  %s5118_s23 = scalar_lea.hbm %s5314_s2, %s5072_s8 }
 0x18e   : > { %s3564_s11 = sshll.u32 %s218_s7, 4  ;;  %s5126_s9 = scalar_lea.sflag [#allocation8], %s3530_s15  ;;  %s5120_s11 = int_to_ptr.vmem [resolvable:$true] %s3564_s11 }
 0x18f   : > { %3524 = vst.msk [vmem:[%s218_s7] sm:$0x3] %vm5052_vm0, %v3523_v45  ;;  %s3890_s4 = scalar_lea.vmem %s5120_s11, 32  ;;  %s4014_s5 = smov [#allocation7]  }
 0x190   : > { %p3891_p6 = scmp.ne.s32.totalorder %s5120_s11, %s3890_s4  ;;  %s3894_s29 = sshll.u32 %s4014_s5, 4  ;;  %s3895_s29 = int_to_ptr.vmem [resolvable:$false] %s3894_s29 }
 0x191   : > { %s3896_s30 = scalar_lea.vmem %s3895_s29, 64  ;;  %p3897_p5 = scmp.lt.s32.totalorder %s5120_s11, %s3895_s29 }
 0x192   : > { %p3892_p13 = pnand %p3891_p6, %p5325_p9  ;;  %p3898_p4 = scmp.lt.s32.totalorder %s3896_s30, %s3890_s4 }
 0x194   : > { %p3893_p2 = pneg %p3892_p13  ;;  %p3899_p7 = por %p3898_p4, %p3897_p5 }
 0x196   : > { %p3900_p10 = pnand %p3899_p7, %p3893_p2 }
 0x198   : > { %3903 = shalt.err (!%p3900_p10)
}
 0x199   : > { %s3904_s18 = scalar_lea.hbm %s5118_s23, 32  ;;  %s3908_s10 = scalar_lea.hbm %s5314_s2, 64 }
 0x19a   : > { %p3905_p12 = scmp.ne.s32.totalorder %s5118_s23, %s3904_s18  ;;  %p3909_p8 = scmp.lt.u32.totalorder %s5118_s23, %s5314_s2 }
 0x19b   : > { %p3910_p11 = scmp.lt.u32.totalorder %s3908_s10, %s3904_s18  ;;  %p3912_p6 = scmp.lt.u32.totalorder %s3904_s18, %s5118_s23 }
 0x19c   : > { %p3906_p1 = pnand %p3905_p12, %p5325_p9 }
 0x19d   : > { %p3911_p0 = por %p3910_p11, %p3909_p8 }
 0x19e   : > { %p3907_p3 = pneg %p3906_p1 }
 0x19f   : > { %p3913_p13 = por %p3912_p6, %p3911_p0 }
 0x1a1   : > { %p3914_p2 = pnand %p3913_p13, %p3907_p3 }
 0x1a3   : > { %3917 = shalt.err (!%p3914_p2)
}
 0x1a4   : > { %3755 = dma.vmem_to_hbm [thread:$0]  (%p5325_p9), %s5120_s11, 32, %s5118_s23, %s5126_s9   ;;  %v5150_v31 = vpop.permute.xlu1 %3226  ;;  %v3218_v6 = vpop.permute.xlu0 %3217  ;;  %v5171_v37 = vand.u32 127, %v232_v7  ;;  %vm3323_vm1 = vcmask 130112   ;;  %vm3330_vm2 = vcmask 195712   ;;  %vm3337_vm3 = vcmask 261312  }
 0x1a5   : > { %vm3344_vm4 = vcmask 326912   ;;  %vm3351_vm5 = vcmask 392512   ;;  %vm3358_vm6 = vcmask 458112   ;;  %vm3365_vm7 = vcmask 523712   ;;  %s225_s11 = scalar_lea.vmem [#allocation9], %s5049_s24  ;;  %s5265_s4 = scalar_lea.hbm %s5315_s3, %s5072_s8 }
 0x1a6   : > { %v3325_v11 = vadd.s32 4294967280, %v5171_v37  ;;  %v3318_v17 = vadd.s32 4294967288, %v5171_v37  ;;  %v3316_v26 = vsub.s32 %v5171_v37, %v4471_v23  ;;  %v3339_v13 = vadd.s32 4294967264, %v5171_v37  ;;  %s3580_s21 = sshll.u32 %s225_s11, 4  ;;  %s4015_s24 = smov [#allocation9]   ;;  %s3581_s21 = int_to_ptr.vmem [resolvable:$true] %s3580_s21 }
 0x1a7   : > { %v3332_v38 = vadd.s32 4294967272, %v5171_v37  ;;  %v3353_v59 = vadd.s32 4294967248, %v5171_v37  ;;  %v3346_v21 = vadd.s32 4294967256, %v5171_v37  ;;  %v3367_v46 = vadd.s32 4294967232, %v5171_v37  ;;  %s3918_s5 = scalar_lea.vmem %s3581_s21, 32  ;;  %s3922_s29 = sshll.u32 %s4015_s24, 4  ;;  %s3923_s29 = int_to_ptr.vmem [resolvable:$false] %s3922_s29 }
 0x1a8   : > { %v5152_v16 = vpop.permute.xlu1 %3229  ;;  %v5160_v58 = vpop.permute.xlu0 %3244  ;;  %v3328_v52 = vsub.s32 %v3325_v11, %v4471_v23  ;;  %v3321_v7 = vsub.s32 %v3318_v17, %v4471_v23  ;;  %v3342_v35 = vsub.s32 %v3339_v13, %v4471_v23  ;;  %v3360_v42 = vadd.s32 4294967240, %v5171_v37  ;;  %p3919_p5 = scmp.ne.s32.totalorder %s3581_s21, %s3918_s5  ;;  %s3924_s30 = scalar_lea.vmem %s3923_s29, 64 }
 0x1a9   : > { %v3335_v57 = vsub.s32 %v3332_v38, %v4471_v23  ;;  %v3356_v43 = vsub.s32 %v3353_v59, %v4471_v23  ;;  %v3349_v41 = vsub.s32 %v3346_v21, %v4471_v23  ;;  %v3317_v48 = vrot.slane %v3218_v6, %v3316_v26  ;;  %p3925_p10 = scmp.lt.s32.totalorder %s3581_s21, %s3923_s29  ;;  %p3926_p12 = scmp.lt.s32.totalorder %s3924_s30, %s3918_s5 }
 0x1aa   : > { %v3322_v54 = vrot.slane %v5074_v63, %v3321_v7  ;;  %v3329_v33 = vrot.slane %v5112_v12, %v3328_v52  ;;  %v3374_v47 = vadd.s32 4294967224, %v5171_v37  ;;  %v3343_v61 = vrot.slane %v5152_v16, %v3342_v35  ;;  %p3920_p4 = pnand %p3919_p5, %p5325_p9 }
 0x1ab   : > { %v3336_v55 = vrot.slane %v5150_v31, %v3335_v57  ;;  %v3370_v12 = vsub.s32 %v3367_v46, %v4471_v23  ;;  %v3363_v6 = vsub.s32 %v3360_v42, %v4471_v23  ;;  %v3381_v16 = vadd.s32 4294967216, %v5171_v37  ;;  %p3927_p1 = por %p3926_p12, %p3925_p10 }
 0x1ac   : > { %v5154_v3 = vpop.permute.xlu1 %3232  ;;  %v3269_v4 = vpop.permute.xlu0 %3268  ;;  %v3324_v51 = vsel %vm3323_vm1, %v3322_v54, %v3317_v48  ;;  %vm3372_vm8 = vcmask 589312   ;;  %vm3379_vm9 = vcmask 654912   ;;  %vm3386_vm10 = vcmask 720512   ;;  %p3921_p7 = pneg %p3920_p4 }
 0x1ad   : > { %v3430_v10 = vrot.slane %v3269_v4, %v3321_v7  ;;  %v3331_v45 = vsel %vm3330_vm2, %v3329_v33, %v3324_v51  ;;  %v3402_v7 = vadd.s32 4294967192, %v5171_v37  ;;  %v3384_v38 = vsub.s32 %v3381_v16, %v4471_v23 }
 0x1ae   : > { %vm3393_vm11 = vcmask 786112   ;;  %vm3400_vm12 = vcmask 851712   ;;  %vm3407_vm13 = vcmask 917312   ;;  %vm3414_vm14 = vcmask 982912   ;;  %p3928_p3 = pnand %p3927_p1, %p3921_p7 }
 0x1af   : > { %vm3421_vm15 = vcmask 1048512  }
 0x1b0   : > { %v5156_v62 = vpop.permute.xlu1 %3235  ;;  %v3275_v49 = vpop.permute.xlu0 %3274 }
 0x1b1   : > { %v3440_v0 = vrot.slane %v3275_v49, %v3335_v57  ;;  %v3357_v17 = vrot.slane %v5156_v62, %v3356_v43 }
 0x1b4   : > { %v5158_v18 = vpop.permute.xlu1 %3238  ;;  %v3281_v5 = vpop.permute.xlu0 %3280 }
 0x1b5   : > { %v3450_v63 = vrot.slane %v3281_v5, %v3349_v41  ;;  %v3350_v5 = vrot.slane %v5154_v3, %v3349_v41 }
 0x1b8   : > { %v5162_v40 = vpop.permute.xlu1 %3241  ;;  %v5164_v19 = vpop.permute.xlu0 %3286 }
 0x1b9   : > { %v3371_v3 = vrot.slane %v5162_v40, %v3370_v12 }
 0x1bc   : > { %v3266_v9 = vpop.permute.xlu1 %3265  ;;  %v5166_v25 = vpop.permute.xlu0 %3292 }
 0x1bd   : > { %v3426_v15 = vrot.slane %v3266_v9, %v3316_v26  ;;  %v3377_v9 = vsub.s32 %v3374_v47, %v4471_v23  ;;  %v3395_v26 = vadd.s32 4294967200, %v5171_v37 }
 0x1bf   : > { %v3431_v29 = vsel %vm3323_vm1, %v3430_v10, %v3426_v15  ;;  %v3409_v15 = vadd.s32 4294967184, %v5171_v37  ;;  %v3470_v10 = vrot.slane %v5166_v25, %v3377_v9  ;;  %v3398_v40 = vsub.s32 %v3395_v26, %v4471_v23 }
 0x1c0   : > { %v3272_v53 = vpop.permute.xlu1 %3271  ;;  %v3378_v54 = vrot.slane %v5160_v58, %v3377_v9 }
 0x1c1   : > { %v5173_v39 = vpop.permute.xlu0 %3295  ;;  %v3435_v30 = vrot.slane %v3272_v53, %v3328_v52  ;;  %v3338_v53 = vsel %vm3337_vm3, %v3336_v55, %v3331_v45 }
 0x1c2   : > { %v3345_v11 = vsel %vm3344_vm4, %v3343_v61, %v3338_v53  ;;  %v3475_v25 = vrot.slane %v5173_v39, %v3384_v38 }
 0x1c3   : > { %v3436_v28 = vsel %vm3330_vm2, %v3435_v30, %v3431_v29  ;;  %v3352_v30 = vsel %vm3351_vm5, %v3350_v5, %v3345_v11  ;;  %v3405_v29 = vsub.s32 %v3402_v7, %v4471_v23 }
 0x1c4   : > { %v3278_v8 = vpop.permute.xlu1 %3277  ;;  %v3441_v44 = vsel %vm3337_vm3, %v3440_v0, %v3436_v28  ;;  %v3359_v59 = vsel %vm3358_vm6, %v3357_v17, %v3352_v30 }
 0x1c5   : > { %v3445_v36 = vrot.slane %v3278_v8, %v3342_v35  ;;  %v3460_v8 = vrot.slane %v5164_v19, %v3363_v6  ;;  %v3416_v35 = vadd.s32 4294967176, %v5171_v37 }
 0x1c7   : > { %v3446_v2 = vsel %vm3344_vm4, %v3445_v36, %v3441_v44  ;;  %v3419_v33 = vsub.s32 %v3416_v35, %v4471_v23 }
 0x1c8   : > { %v3284_v24 = vpop.permute.xlu1 %3283  ;;  %v3451_v4 = vsel %vm3351_vm5, %v3450_v63, %v3446_v2 }
 0x1c9   : > { %v3455_v60 = vrot.slane %v3284_v24, %v3356_v43  ;;  %v3388_v24 = vadd.s32 4294967208, %v5171_v37  ;;  %v3412_v37 = vsub.s32 %v3409_v15, %v4471_v23 }
 0x1cb   : > { %v3456_v31 = vsel %vm3358_vm6, %v3455_v60, %v3451_v4 }
 0x1cc   : > { %v5168_v14 = vpop.permute.xlu1 %3289  ;;  %v5183_v1 = vpop.permute.xlu0 %3298  ;;  %v3461_v13 = vsel %vm3365_vm7, %v3460_v8, %v3456_v31 }
 0x1cd   : > { %v3465_v49 = vrot.slane %v5168_v14, %v3370_v12  ;;  %v3364_v14 = vrot.slane %v5158_v18, %v3363_v6  ;;  %v3391_v18 = vsub.s32 %v3388_v24, %v4471_v23 }
 0x1cf   : > { %v3466_v19 = vsel %vm3372_vm8, %v3465_v49, %v3461_v13  ;;  %v3366_v57 = vsel %vm3365_vm7, %v3364_v14, %v3359_v59  ;;  %v3480_v43 = vrot.slane %v5183_v1, %v3391_v18 }
 0x1d0   : > { %v5177_v22 = vpop.permute.xlu1 %3247  ;;  %v3471_v21 = vsel %vm3379_vm9, %v3470_v10, %v3466_v19  ;;  %v3373_v28 = vsel %vm3372_vm8, %v3371_v3, %v3366_v57 }
 0x1d1   : > { %v3385_v36 = vrot.slane %v5177_v22, %v3384_v38  ;;  %v3476_v41 = vsel %vm3386_vm10, %v3475_v25, %v3471_v21  ;;  %v3380_v22 = vsel %vm3379_vm9, %v3378_v54, %v3373_v28 }
 0x1d2   : > { %v3481_v23 = vsel %vm3393_vm11, %v3480_v43, %v3476_v41 }
 0x1d3   : > { %v3387_v1 = vsel %vm3386_vm10, %v3385_v36, %v3380_v22 }
 0x1d4   : > { %v5189_v27 = vpop.permute.xlu1 %3250 }
 0x1d5   : > { %v3392_v46 = vrot.slane %v5189_v27, %v3391_v18 }
 0x1d6   : > { %v5195_v20 = vpop.permute.xlu0 %3301 }
 0x1d7   : > { %v3485_v42 = vrot.slane %v5195_v20, %v3398_v40  ;;  %v3394_v2 = vsel %vm3393_vm11, %v3392_v46, %v3387_v1 }
 0x1d9   : > { %v3486_v20 = vsel %vm3400_vm12, %v3485_v42, %v3481_v23 }
 0x1dc   : > { %v5206_v50 = vpop.permute.xlu1 %3253 }
 0x1dd   : > { %v3399_v39 = vrot.slane %v5206_v50, %v3398_v40 }
 0x1df   : > { %v3401_v50 = vsel %vm3400_vm12, %v3399_v39, %v3394_v2 }
 0x1e1   : > { %v5212_v32 = vpop.permute.xlu0 %3304 }
 0x1e2   : > { %v3490_v48 = vrot.slane %v5212_v32, %v3405_v29 }
 0x1e4   : > { %v3491_v63 = vsel %vm3407_vm13, %v3490_v48, %v3486_v20 }
 0x1e6   : > { %v3257_v52 = vpop.permute.xlu1 %3256 }
 0x1e7   : > { %v3406_v58 = vrot.slane %v3257_v52, %v3405_v29 }
 0x1e9   : > { %v3408_v51 = vsel %vm3407_vm13, %v3406_v58, %v3401_v50 }
 0x1eb   : > { %v3308_v62 = vpop.permute.xlu0 %3307 }
 0x1ec   : > { %v3495_v27 = vrot.slane %v3308_v62, %v3412_v37 }
 0x1ee   : > { %v3496_v12 = vsel %vm3414_vm14, %v3495_v27, %v3491_v63 }
 0x1f1   : > { %v3260_v0 = vpop.permute.xlu1 %3259 }
 0x1f2   : > { %v3413_v47 = vrot.slane %v3260_v0, %v3412_v37 }
 0x1f4   : > { %v3415_v32 = vsel %vm3414_vm14, %v3413_v47, %v3408_v51 }
 0x1f6   : > { %v3311_v44 = vpop.permute.xlu0 %3310 }
 0x1f7   : > { %v3500_v60 = vrot.slane %v3311_v44, %v3419_v33 }
 0x1f9   : > { %v3501_v45 = vsel %vm3421_vm15, %v3500_v60, %v3496_v12 }
 0x1fb   : > { %v3263_v55 = vpop.permute.xlu1 %3262 }
 0x1fc   : > { %v3420_v61 = vrot.slane %v3263_v55, %v3419_v33 }
 0x1fe   : > { %v3422_v6 = vsel %vm3421_vm15, %v3420_v61, %v3415_v32 }
 0x1ff   : > { %v3502_v4 = vcombine.low %v3422_v6, %v3501_v45 }
 0x201   : > { %v3509_v9 = vrot.slane %v3502_v4, %v4498_v34 }
 0x203   : > { %v3516_v31 = vrot.slane %v3509_v9, %v4498_v34 }
 0x205   : > { %3518 = vst.msk [vmem:[%s225_s11] sm:$0x3] %vm5052_vm0, %v3516_v31 }
 0x206   : > { %3931 = shalt.err (!%p3928_p3)
}
 0x207   : > { %s3932_s8 = scalar_lea.hbm %s5265_s4, 32  ;;  %s3936_s6 = scalar_lea.hbm %s5315_s3, 64 }
 0x208   : > { %p3933_p8 = scmp.ne.s32.totalorder %s5265_s4, %s3932_s8  ;;  %p3937_p6 = scmp.lt.u32.totalorder %s5265_s4, %s5315_s3 }
 0x209   : > { %p3938_p13 = scmp.lt.u32.totalorder %s3936_s6, %s3932_s8  ;;  %p3940_p5 = scmp.lt.u32.totalorder %s3932_s8, %s5265_s4 }
 0x20a   : > { %p3934_p11 = pnand %p3933_p8, %p5325_p9 }
 0x20b   : > { %p3939_p2 = por %p3938_p13, %p3937_p6 }
 0x20c   : > { %p3935_p0 = pneg %p3934_p11 }
 0x20d   : > { %p3941_p4 = por %p3940_p5, %p3939_p2 }
 0x20f   : > { %p3942_p7 = pnand %p3941_p4, %p3935_p0 }
 0x211   : > { %3945 = shalt.err (!%p3942_p7)
}
 0x212   : > { %3756 = dma.vmem_to_hbm [thread:$0]  (%p5325_p9), %s3581_s21, 32, %s5265_s4, %s5126_s9  }
 0x213 PF: > { %s3592_s7 = sand.u32 1, %s3984_s12   ;;  %p5326_p10 = scmp.ne.s32.totalorder %s5320_s27, 0 }
 0x214   : > { %p5327_p12 = scmp.ge.s32.totalorder %s4004_s17, 2  ;;  %s3593_s11 = scalar_lea.sflag [#allocation5], %s3592_s7 }
 0x216   : > { %p3765_p1 = pnand %p5327_p12, %p5326_p10 }
 0x218   : > { %3975 = dma.done.wait (!%p3765_p1), %s3593_s11, 32  }
 0x219   : > { %3977 = vsyncadd (!%p3765_p1), %s3593_s11, 4294967264  ;;  %s3601_s22 = sand.u32 1, %s3726_s19  }
 0x21a   : > { %s3602_s23 = scalar_lea.sflag [#allocation8], %s3601_s22 }
 0x21b   : > { %3979 = dma.done.wait (!%p3765_p1), %s3602_s23, 64  }
 0x21c   : > { %3981 = vsyncadd (!%p3765_p1), %s3602_s23, 4294967232  ;;  %s23_s17 = sadd.s32 1, %s4004_s17   ;;  %s5328_s12 = smov %s3988_s13 }
 0x21d   : > { %p20_p9 = scmp.ge.s32.totalorder %s23_s17, 4   ;;  %s5329_s13 = smov %s3992_s14 }
 0x21e   : > { %s5330_s14 = smov %s4098_s26  ;;  %s5331_s15 = smov %s4000_s16 }
 0x21f   : > { %s5332_s16 = smov %s5334_s20  ;;  %22 = sbr.rel (!%p20_p9) target bundleno = 8 (0x8), region = 109 }
 0x226   :  { %3616 = vsyncpa [#allocation4], 1 }
 0x227   :  { %3618 = vsyncpa [#allocation4 + $0x1], 1 }
 0x228   :  { %3619 = vsyncpa [#allocation5], 1 }
 0x229   :  { %3621 = vsyncpa [#allocation5 + $0x1], 1 }
 0x22a   :  { %3622 = vsyncpa [#allocation8], 1 }
 0x22b   :  { %3624 = vsyncpa [#allocation8 + $0x1], 1 }

</bundles_post_ra>
